<compile_context>
chip_gen: v7x
topology: tpu7x:2x2x1
jax: 0.10.0
libtpu: 0.0.40
codegen_flags: <defaults>
</compile_context>

<pallas_src>
import functools

import jax
import jax.numpy as jnp
from jax.experimental import pallas as pl
from jax.experimental.pallas import tpu as pltpu

HIDDEN_LAYERS = [128, 64, 32, 16]


def mlp_kernel(x_ref,
               w1_ref, b1_ref,
               w2_ref, b2_ref,
               w3_ref, b3_ref,
               w4_ref, b4_ref,
               w5_ref, b5_ref,
               o_ref,
               *, act_dtype):
    """Fused MLP forward for one [batch_tile, D] tile; all weights resident in VMEM."""
    h = x_ref[...]  # bf16 [bt, D]

    # (Linear -> Sigmoid -> Dropout[eval=identity]) x 4.
    # bf16 MXU operands, f32 accumulate + f32 bias; sigmoid in tanh form (1 EUP op/elem).
    for w_ref, b_ref in ((w1_ref, b1_ref), (w2_ref, b2_ref),
                         (w3_ref, b3_ref), (w4_ref, b4_ref)):
        z = jnp.dot(h, w_ref[...], preferred_element_type=jnp.float32) + b_ref[...]
        s = jnp.tanh(0.5 * z.astype(act_dtype))       # EUP (bf16 on v6e/v7x, f32 on v5e)
        h = (0.5 * s + 0.5).astype(jnp.bfloat16)      # VPU (has slack); bf16 MXU LHS

    # Head: Linear(16 -> 1), computed as W5 [1,16] contracted with h [bt,16] on the
    # feature dim (A @ B^T form) so the result is a lane-dense [1, batch_tile] row.
    out_row = jax.lax.dot_general(
        w5_ref[...], h,
        dimension_numbers=(((1,), (1,)), ((), ())),
        preferred_element_type=jnp.float32) + b5_ref[...]
    o_ref[...] = out_row.astype(o_ref.dtype)


def _default_act_dtype():
    """bf16 VPU/EUP exist only on v6e / v7x; keep elementwise math f32 elsewhere."""
    try:
        kind = jax.devices()[0].device_kind.lower()
    except Exception:
        return jnp.float32
    return jnp.bfloat16 if any(t in kind for t in ("v6", "v7", "7x")) else jnp.float32


def _choose_batch_tile(B, max_tile=4096, min_tile=256):
    """Largest multiple of 256 <= max_tile that still gives >= 2 grid steps
    (keeps both v7x TensorCores busy); never below min_tile."""
    half = -(-B // 2)                       # ceil(B / 2)
    bt = ((half + 255) // 256) * 256        # round up to a multiple of 256
    return max(min_tile, min(max_tile, bt))


def mlp_forward(x, params, *, batch_tile=None, act_dtype=None):
    """x: [B, input_dim] f32. params: 5 x (W [in, out], b [1, out]). Returns [B, 1] f32."""
    B, D = x.shape
    if batch_tile is None:
        batch_tile = _choose_batch_tile(B)
    assert batch_tile % 128 == 0, "batch_tile must be a multiple of 128 (lane width)"
    if act_dtype is None:
        act_dtype = _default_act_dtype()

    (w1, b1), (w2, b2), (w3, b3), (w4, b4), (w5, b5) = params
    w5_row = w5.reshape(1, -1)          # [16, 1] -> [1, 16] (PyTorch [out, in] layout)

    # One-time bf16 cast of x and all weights (halves HBM traffic, no per-step casts).
    # Biases stay f32; matmuls accumulate in f32.
    x = x.astype(jnp.bfloat16)
    w1, w2, w3, w4, w5_row = (a.astype(jnp.bfloat16)
                              for a in (w1, w2, w3, w4, w5_row))

    # Pad batch up to a multiple of batch_tile (padding rows sliced off at the end).
    num_tiles = pl.cdiv(B, batch_tile)
    Bp = num_tiles * batch_tile
    if Bp != B:
        x = jnp.pad(x, ((0, Bp - B), (0, 0)))

    x_spec = pl.BlockSpec((batch_tile, D), lambda i: (i, 0))
    # Lane-dense output: one [1, batch_tile] row per grid step (leading dim squeezed).
    out_spec = pl.BlockSpec((None, 1, batch_tile), lambda i: (i, 0, 0))

    # Grid-invariant weights/biases: full-array blocks, replicated across grid steps.
    def full_spec(arr):
        return pl.BlockSpec(arr.shape, lambda i: (0, 0))

    flat_params = (w1, b1, w2, b2, w3, b3, w4, b4, w5_row, b5)
    in_specs = [x_spec] + [full_spec(a) for a in flat_params]

    dims = [D] + HIDDEN_LAYERS + [1]
    flops = 2 * Bp * sum(a * b for a, b in zip(dims[:-1], dims[1:]))
    transcendentals = Bp * sum(HIDDEN_LAYERS)        # one tanh per hidden activation
    bytes_accessed = (Bp * D * 2 + Bp * 4
                      + sum(int(a.size) * a.dtype.itemsize for a in flat_params))

    kernel = functools.partial(mlp_kernel, act_dtype=act_dtype)

    out3 = pl.pallas_call(
        kernel,
        out_shape=jax.ShapeDtypeStruct((num_tiles, 1, batch_tile), jnp.float32),
        grid_spec=pltpu.PrefetchScalarGridSpec(
            num_scalar_prefetch=0,
            grid=(num_tiles,),
            in_specs=in_specs,
            out_specs=out_spec,
        ),
        compiler_params=pltpu.CompilerParams(
            dimension_semantics=("parallel",)),
        cost_estimate=pl.CostEstimate(
            flops=int(flops),
            transcendentals=int(transcendentals),
            bytes_accessed=int(bytes_accessed)),
    )(x, *flat_params)

    # (num_tiles, 1, batch_tile) -> (Bp, 1), drop padding.
    return out3.reshape(-1, 1)[:B]


def init_params(key, input_dim, hidden_layers):
    """Deterministic init matching nn.Linear's U(+-1/sqrt(fan_in)).
    W stored as [in, out], b as [1, out]."""
    params = []
    dims = [input_dim] + hidden_layers + [1]
    for i in range(len(dims) - 1):
        fan_in, fan_out = dims[i], dims[i + 1]
        key, kw, kb = jax.random.split(key, 3)
        bound = 1.0 / jnp.sqrt(fan_in)
        w = jax.random.uniform(kw, (fan_in, fan_out), jnp.float32, -bound, bound)
        b = jax.random.uniform(kb, (1, fan_out), jnp.float32, -bound, bound)
        params.append((w, b))
    return params


def mlp_reference(x, params):
    """Pure-JAX f32 reference of the same forward pass (eval-mode dropout)."""
    h = x
    for i, (w, b) in enumerate(params):
        h = h @ w + b
        if i < len(params) - 1:
            h = jax.nn.sigmoid(h)
    return h


if __name__ == "__main__":
    key = jax.random.PRNGKey(0)
    batch = 512        # small demo; adaptive batch_tile -> 256 => 2 parallel grid steps
    input_dim = 32     # stand-in for X_train_scaled.shape[1]

    key, kx = jax.random.split(key)
    x = jax.random.normal(kx, (batch, input_dim), jnp.float32)

    params = init_params(key, input_dim, HIDDEN_LAYERS)

    out = mlp_forward(x, params)
    out = jax.block_until_ready(out)

    ref = mlp_reference(x, params)
    assert out.shape == (batch, 1)
    # bf16 input/weights/activations => looser tolerance vs pure-f32 reference.
    assert jnp.allclose(out, ref, atol=5e-2, rtol=5e-2), (
        "mismatch vs reference: max abs err "
        f"{float(jnp.max(jnp.abs(out - ref))):.3e}")

    print("KERNEL_OK")
</pallas_src>

<mosaic_0001>
module attributes {stable_mosaic.version = 11 : i64} {
  func.func @mlp_kernel(%arg0: i32, %arg1: memref<256x32xbf16, #tpu.memory_space<vmem>>, %arg2: memref<32x128xbf16, #tpu.memory_space<vmem>>, %arg3: memref<1x128xf32, #tpu.memory_space<vmem>>, %arg4: memref<128x64xbf16, #tpu.memory_space<vmem>>, %arg5: memref<1x64xf32, #tpu.memory_space<vmem>>, %arg6: memref<64x32xbf16, #tpu.memory_space<vmem>>, %arg7: memref<1x32xf32, #tpu.memory_space<vmem>>, %arg8: memref<32x16xbf16, #tpu.memory_space<vmem>>, %arg9: memref<1x16xf32, #tpu.memory_space<vmem>>, %arg10: memref<1x16xbf16, #tpu.memory_space<vmem>>, %arg11: memref<1x1xf32, #tpu.memory_space<vmem>>, %arg12: memref<1x1x256xf32, #tpu.memory_space<vmem>>) attributes {dimension_semantics = [#tpu.dimension_semantics<parallel>], iteration_bounds = array<i64: 2>, scalar_prefetch = 0 : i64, scratch_operands = 0 : i64, tpu.core_type = #tpu.core_type<tc>, window_params = [{transform_indices = @transform_0, window_bounds = array<i64: 256, 32>}, {pipeline_mode = #tpu.pipeline_mode<synchronous>, transform_indices = @transform_1, window_bounds = array<i64: 32, 128>}, {pipeline_mode = #tpu.pipeline_mode<synchronous>, transform_indices = @transform_2, window_bounds = array<i64: 1, 128>}, {pipeline_mode = #tpu.pipeline_mode<synchronous>, transform_indices = @transform_3, window_bounds = array<i64: 128, 64>}, {pipeline_mode = #tpu.pipeline_mode<synchronous>, transform_indices = @transform_4, window_bounds = array<i64: 1, 64>}, {pipeline_mode = #tpu.pipeline_mode<synchronous>, transform_indices = @transform_5, window_bounds = array<i64: 64, 32>}, {pipeline_mode = #tpu.pipeline_mode<synchronous>, transform_indices = @transform_6, window_bounds = array<i64: 1, 32>}, {pipeline_mode = #tpu.pipeline_mode<synchronous>, transform_indices = @transform_7, window_bounds = array<i64: 32, 16>}, {pipeline_mode = #tpu.pipeline_mode<synchronous>, transform_indices = @transform_8, window_bounds = array<i64: 1, 16>}, {pipeline_mode = #tpu.pipeline_mode<synchronous>, transform_indices = @transform_9, window_bounds = array<i64: 1, 16>}, {pipeline_mode = #tpu.pipeline_mode<synchronous>, transform_indices = @transform_10, window_bounds = array<i64: 1, 1>}, {transform_indices = @transform_11, window_bounds = array<i64: 1, 1, 256>}]} {
    %c0 = arith.constant 0 : index
    %c0_0 = arith.constant 0 : index
    %0 = vector.load %arg1[%c0, %c0_0] : memref<256x32xbf16, #tpu.memory_space<vmem>>, vector<256x32xbf16>
    %c0_1 = arith.constant 0 : index
    %c0_2 = arith.constant 0 : index
    %1 = vector.load %arg2[%c0_1, %c0_2] : memref<32x128xbf16, #tpu.memory_space<vmem>>, vector<32x128xbf16>
    %cst = arith.constant dense<0.000000e+00> : vector<256x128xf32>
    %2 = tpu.matmul %0, %1, %cst {dimension_numbers = #tpu.dot_dimension_numbers<[1], [0], [0], [1], [0, 0, 1, 1], [], []>} : vector<256x32xbf16>, vector<32x128xbf16>, vector<256x128xf32> -> vector<256x128xf32>
    %c0_3 = arith.constant 0 : index
    %c0_4 = arith.constant 0 : index
    %3 = vector.load %arg3[%c0_3, %c0_4] : memref<1x128xf32, #tpu.memory_space<vmem>>, vector<1x128xf32>
    %4 = vector.broadcast %3 : vector<1x128xf32> to vector<256x128xf32>
    %5 = arith.addf %2, %4 : vector<256x128xf32>
    %cst_5 = arith.constant 5.000000e-01 : f32
    %6 = vector.broadcast %cst_5 : f32 to vector<256x128xf32>
    %7 = arith.mulf %6, %5 : vector<256x128xf32>
    %8 = math.tanh %7 : vector<256x128xf32>
    %cst_6 = arith.constant 5.000000e-01 : f32
    %9 = vector.broadcast %cst_6 : f32 to vector<256x128xf32>
    %10 = arith.mulf %9, %8 : vector<256x128xf32>
    %cst_7 = arith.constant 5.000000e-01 : f32
    %11 = vector.broadcast %cst_7 : f32 to vector<256x128xf32>
    %12 = arith.addf %10, %11 : vector<256x128xf32>
    %13 = arith.truncf %12 : vector<256x128xf32> to vector<256x128xbf16>
    %c0_8 = arith.constant 0 : index
    %c0_9 = arith.constant 0 : index
    %14 = vector.load %arg4[%c0_8, %c0_9] : memref<128x64xbf16, #tpu.memory_space<vmem>>, vector<128x64xbf16>
    %cst_10 = arith.constant dense<0.000000e+00> : vector<256x64xf32>
    %15 = tpu.matmul %13, %14, %cst_10 {dimension_numbers = #tpu.dot_dimension_numbers<[1], [0], [0], [1], [0, 0, 1, 1], [], []>} : vector<256x128xbf16>, vector<128x64xbf16>, vector<256x64xf32> -> vector<256x64xf32>
    %c0_11 = arith.constant 0 : index
    %c0_12 = arith.constant 0 : index
    %16 = vector.load %arg5[%c0_11, %c0_12] : memref<1x64xf32, #tpu.memory_space<vmem>>, vector<1x64xf32>
    %17 = vector.broadcast %16 : vector<1x64xf32> to vector<256x64xf32>
    %18 = arith.addf %15, %17 : vector<256x64xf32>
    %cst_13 = arith.constant 5.000000e-01 : f32
    %19 = vector.broadcast %cst_13 : f32 to vector<256x64xf32>
    %20 = arith.mulf %19, %18 : vector<256x64xf32>
    %21 = math.tanh %20 : vector<256x64xf32>
    %cst_14 = arith.constant 5.000000e-01 : f32
    %22 = vector.broadcast %cst_14 : f32 to vector<256x64xf32>
    %23 = arith.mulf %22, %21 : vector<256x64xf32>
    %cst_15 = arith.constant 5.000000e-01 : f32
    %24 = vector.broadcast %cst_15 : f32 to vector<256x64xf32>
    %25 = arith.addf %23, %24 : vector<256x64xf32>
    %26 = arith.truncf %25 : vector<256x64xf32> to vector<256x64xbf16>
    %c0_16 = arith.constant 0 : index
    %c0_17 = arith.constant 0 : index
    %27 = vector.load %arg6[%c0_16, %c0_17] : memref<64x32xbf16, #tpu.memory_space<vmem>>, vector<64x32xbf16>
    %cst_18 = arith.constant dense<0.000000e+00> : vector<256x32xf32>
    %28 = tpu.matmul %26, %27, %cst_18 {dimension_numbers = #tpu.dot_dimension_numbers<[1], [0], [0], [1], [0, 0, 1, 1], [], []>} : vector<256x64xbf16>, vector<64x32xbf16>, vector<256x32xf32> -> vector<256x32xf32>
    %c0_19 = arith.constant 0 : index
    %c0_20 = arith.constant 0 : index
    %29 = vector.load %arg7[%c0_19, %c0_20] : memref<1x32xf32, #tpu.memory_space<vmem>>, vector<1x32xf32>
    %30 = vector.broadcast %29 : vector<1x32xf32> to vector<256x32xf32>
    %31 = arith.addf %28, %30 : vector<256x32xf32>
    %cst_21 = arith.constant 5.000000e-01 : f32
    %32 = vector.broadcast %cst_21 : f32 to vector<256x32xf32>
    %33 = arith.mulf %32, %31 : vector<256x32xf32>
    %34 = math.tanh %33 : vector<256x32xf32>
    %cst_22 = arith.constant 5.000000e-01 : f32
    %35 = vector.broadcast %cst_22 : f32 to vector<256x32xf32>
    %36 = arith.mulf %35, %34 : vector<256x32xf32>
    %cst_23 = arith.constant 5.000000e-01 : f32
    %37 = vector.broadcast %cst_23 : f32 to vector<256x32xf32>
    %38 = arith.addf %36, %37 : vector<256x32xf32>
    %39 = arith.truncf %38 : vector<256x32xf32> to vector<256x32xbf16>
    %c0_24 = arith.constant 0 : index
    %c0_25 = arith.constant 0 : index
    %40 = vector.load %arg8[%c0_24, %c0_25] : memref<32x16xbf16, #tpu.memory_space<vmem>>, vector<32x16xbf16>
    %cst_26 = arith.constant dense<0.000000e+00> : vector<256x16xf32>
    %41 = tpu.matmul %39, %40, %cst_26 {dimension_numbers = #tpu.dot_dimension_numbers<[1], [0], [0], [1], [0, 0, 1, 1], [], []>} : vector<256x32xbf16>, vector<32x16xbf16>, vector<256x16xf32> -> vector<256x16xf32>
    %c0_27 = arith.constant 0 : index
    %c0_28 = arith.constant 0 : index
    %42 = vector.load %arg9[%c0_27, %c0_28] : memref<1x16xf32, #tpu.memory_space<vmem>>, vector<1x16xf32>
    %43 = vector.broadcast %42 : vector<1x16xf32> to vector<256x16xf32>
    %44 = arith.addf %41, %43 : vector<256x16xf32>
    %cst_29 = arith.constant 5.000000e-01 : f32
    %45 = vector.broadcast %cst_29 : f32 to vector<256x16xf32>
    %46 = arith.mulf %45, %44 : vector<256x16xf32>
    %47 = math.tanh %46 : vector<256x16xf32>
    %cst_30 = arith.constant 5.000000e-01 : f32
    %48 = vector.broadcast %cst_30 : f32 to vector<256x16xf32>
    %49 = arith.mulf %48, %47 : vector<256x16xf32>
    %cst_31 = arith.constant 5.000000e-01 : f32
    %50 = vector.broadcast %cst_31 : f32 to vector<256x16xf32>
    %51 = arith.addf %49, %50 : vector<256x16xf32>
    %52 = arith.truncf %51 : vector<256x16xf32> to vector<256x16xbf16>
    %c0_32 = arith.constant 0 : index
    %c0_33 = arith.constant 0 : index
    %53 = vector.load %arg10[%c0_32, %c0_33] : memref<1x16xbf16, #tpu.memory_space<vmem>>, vector<1x16xbf16>
    %cst_34 = arith.constant dense<0.000000e+00> : vector<1x256xf32>
    %54 = tpu.matmul %53, %52, %cst_34 {dimension_numbers = #tpu.dot_dimension_numbers<[1], [1], [0], [0], [0, 0, 1, 0], [], []>} : vector<1x16xbf16>, vector<256x16xbf16>, vector<1x256xf32> -> vector<1x256xf32>
    %c0_35 = arith.constant 0 : index
    %c0_36 = arith.constant 0 : index
    %55 = vector.load %arg11[%c0_35, %c0_36] : memref<1x1xf32, #tpu.memory_space<vmem>>, vector<1x1xf32>
    %56 = vector.broadcast %55 : vector<1x1xf32> to vector<1x256xf32>
    %57 = arith.addf %54, %56 : vector<1x256xf32>
    %c0_37 = arith.constant 0 : index
    %c0_38 = arith.constant 0 : index
    %c0_39 = arith.constant 0 : index
    %58 = vector.load %arg12[%c0_37, %c0_38, %c0_39] : memref<1x1x256xf32, #tpu.memory_space<vmem>>, vector<1x1x256xf32>
    %59 = vector.shape_cast %58 : vector<1x1x256xf32> to vector<1x256xf32>
    %60 = vector.shape_cast %57 : vector<1x256xf32> to vector<1x1x256xf32>
    tpu.vector_store %arg12[%c0_37, %c0_38, %c0_39], %60 {strides = array<i32>} : memref<1x1x256xf32, #tpu.memory_space<vmem>>, vector<1x1x256xf32>,
    return
  }
  func.func @transform_0(%arg0: i32) -> (i32, i32) {
    %c0_i32 = arith.constant 0 : i32
    %c0_i32_0 = arith.constant 0 : i32
    return %arg0, %c0_i32 : i32, i32
  }
  func.func @transform_1(%arg0: i32) -> (i32, i32) {
    %c0_i32 = arith.constant 0 : i32
    %c0_i32_0 = arith.constant 0 : i32
    %c0_i32_1 = arith.constant 0 : i32
    return %c0_i32, %c0_i32_0 : i32, i32
  }
  func.func @transform_2(%arg0: i32) -> (i32, i32) {
    %c0_i32 = arith.constant 0 : i32
    %c0_i32_0 = arith.constant 0 : i32
    %c0_i32_1 = arith.constant 0 : i32
    return %c0_i32, %c0_i32_0 : i32, i32
  }
  func.func @transform_3(%arg0: i32) -> (i32, i32) {
    %c0_i32 = arith.constant 0 : i32
    %c0_i32_0 = arith.constant 0 : i32
    %c0_i32_1 = arith.constant 0 : i32
    return %c0_i32, %c0_i32_0 : i32, i32
  }
  func.func @transform_4(%arg0: i32) -> (i32, i32) {
    %c0_i32 = arith.constant 0 : i32
    %c0_i32_0 = arith.constant 0 : i32
    %c0_i32_1 = arith.constant 0 : i32
    return %c0_i32, %c0_i32_0 : i32, i32
  }
  func.func @transform_5(%arg0: i32) -> (i32, i32) {
    %c0_i32 = arith.constant 0 : i32
    %c0_i32_0 = arith.constant 0 : i32
    %c0_i32_1 = arith.constant 0 : i32
    return %c0_i32, %c0_i32_0 : i32, i32
  }
  func.func @transform_6(%arg0: i32) -> (i32, i32) {
    %c0_i32 = arith.constant 0 : i32
    %c0_i32_0 = arith.constant 0 : i32
    %c0_i32_1 = arith.constant 0 : i32
    return %c0_i32, %c0_i32_0 : i32, i32
  }
  func.func @transform_7(%arg0: i32) -> (i32, i32) {
    %c0_i32 = arith.constant 0 : i32
    %c0_i32_0 = arith.constant 0 : i32
    %c0_i32_1 = arith.constant 0 : i32
    return %c0_i32, %c0_i32_0 : i32, i32
  }
  func.func @transform_8(%arg0: i32) -> (i32, i32) {
    %c0_i32 = arith.constant 0 : i32
    %c0_i32_0 = arith.constant 0 : i32
    %c0_i32_1 = arith.constant 0 : i32
    return %c0_i32, %c0_i32_0 : i32, i32
  }
  func.func @transform_9(%arg0: i32) -> (i32, i32) {
    %c0_i32 = arith.constant 0 : i32
    %c0_i32_0 = arith.constant 0 : i32
    %c0_i32_1 = arith.constant 0 : i32
    return %c0_i32, %c0_i32_0 : i32, i32
  }
  func.func @transform_10(%arg0: i32) -> (i32, i32) {
    %c0_i32 = arith.constant 0 : i32
    %c0_i32_0 = arith.constant 0 : i32
    %c0_i32_1 = arith.constant 0 : i32
    return %c0_i32, %c0_i32_0 : i32, i32
  }
  func.func @transform_11(%arg0: i32) -> (i32, i32, i32) {
    %c0_i32 = arith.constant 0 : i32
    %c0_i32_0 = arith.constant 0 : i32
    %c0_i32_1 = arith.constant 0 : i32
    return %arg0, %c0_i32, %c0_i32_0 : i32, i32, i32
  }
}

</mosaic_0001>

<bundles_post_ra>
// kernel: tpu_custom_call.1
= control target key start
LH: loop header
LB: loop body
LE: loop exit
PB: predicated region body
PF: predicated region fallthrough
CT: control target
= control target key end

     0   :  { %s3507_s0 = inlined_call_operand.vmem [shape: bf16[512,32], index: 0, kind: input, shape index: {}]   ;;  %s3508_s1 = inlined_call_operand.vmem [shape: bf16[32,128], index: 1, kind: input, shape index: {}]   ;;  %s3509_s2 = inlined_call_operand.vmem [shape: f32[1,128], index: 2, kind: input, shape index: {}]   ;;  %s3510_s3 = inlined_call_operand.vmem [shape: bf16[128,64], index: 3, kind: input, shape index: {}]   ;;  %s3511_s4 = inlined_call_operand.vmem [shape: f32[1,64], index: 4, kind: input, shape index: {}]   ;;  %s3512_s5 = inlined_call_operand.vmem [shape: bf16[64,32], index: 5, kind: input, shape index: {}]   ;;  %s3513_s6 = inlined_call_operand.vmem [shape: f32[1,32], index: 6, kind: input, shape index: {}]   ;;  %s3514_s7 = inlined_call_operand.vmem [shape: bf16[32,16], index: 7, kind: input, shape index: {}]   ;;  %s3515_s8 = inlined_call_operand.vmem [shape: f32[1,16], index: 8, kind: input, shape index: {}]   ;;  %s3516_s9 = inlined_call_operand.vmem [shape: bf16[1,16], index: 9, kind: input, shape index: {}]   ;;  %s3517_s10 = inlined_call_operand.<no memory space> [shape: f32[1,1], index: 10, kind: input, shape index: {}]   ;;  %s3518_s11 = inlined_call_operand.hbm [shape: f32[2,1,256], index: 11, kind: output, shape index: {}]  }
   0x1   :  { %v16_v0 = vstv %s3517_s10 }
   0x2   :  { %17 = vst [vmem:[#allocation2] sm:$0x1] %v16_v0 }
   0x3   :  { %18 = vsyncpa [#allocation4], 0 }
   0x4   :  { %20 = vsyncpa [#allocation4 + $0x1], 0  ;;  %s3049_s19 = smov 0   ;;  %s3051_s20 = smov 0  }
   0x5   :  { %s3053_s21 = smov 0   ;;  %s3055_s22 = smov 0  }
   0x6 LB: > { %s2224_s10 = sadd.s32 4294967295, %s2981_s22   ;;  %s2225_s23 = sadd.s32 4294967294, %s2981_s22   ;;  %s2981_s22 = sphi %s3055_s22, %s3524_s22   ;;  %s2977_s21 = sphi %s3053_s21, %s3523_s21   ;;  %s2973_s20 = sphi %s3051_s20, %s3522_s20   ;;  %s2969_s19 = sphi %s3049_s19, %s3521_s19  }
   0x7   : > { %s3072_s24 = sadd.s32 1, %s2981_s22   ;;  %s269_s25 = sadd.s32 1, %s2977_s21 }
   0x8   : > { %s266_s26 = ssub.s32 %s2981_s22, %s3072_s24  ;;  %p279_p0 = scmp.ne.s32.totalorder %s2977_s21, %s2973_s20 }
   0x9   : > { %p267_p1 = scmp.eq.s32.totalorder %s266_s26, 0  ;;  %p280_p2 = scmp.eq.s32.totalorder %s2224_s10, 1 }
   0xa   : > { %p285_p3 = scmp.ne.s32.totalorder %s2973_s20, %s2969_s19  ;;  %p286_p4 = scmp.eq.s32.totalorder %s2225_s23, 1 }
   0xb   : > { %s3082_s27 = scalar_select %p267_p1, %s2977_s21, %s269_s25  }
   0xc   : > { %p3084_p5 = por %p280_p2, %p279_p0  ;;  %p3088_p6 = por %p286_p4, %p285_p3 }
   0xd   : > { %p2228_p7 = scmp.ge.s32.totalorder %s2981_s22, 1  ;;  %p343_p8 = scmp.lt.s32.totalorder %s2981_s22, 3 }
   0xf   : > { %p344_p9 = pnand %p2228_p7, %p343_p8 }
  0x10   : > { %v2631_v1 = vld [vmem:[%s3508_s1] sm:$0xff] (!%p344_p9)   ;;  %s3097_s13 = sshll.u32 (!%p344_p9), %s2224_s10, 5  ;;  %v2632_v2 = vld [vmem:[%s3508_s1 + $0x8] sm:$0xff] (!%p344_p9)   ;;  %vm525_vm0 = vcmask (!%p344_p9), 261120   ;;  %v2651_v21 = vld [vmem:[%s3510_s3 + $0x10] sm:$0xff] (!%p344_p9)   ;;  %vm1294_vm1 = vcmask (!%p344_p9), 523264  }
  0x11   : > { %347 = sbr.rel (%p344_p9) target bundleno = 1308 (0x51c), region = 64  ;;  %p384_p10 = scmp.lt.s32.totalorder (!%p344_p9), %s3097_s13, 63  ;;  %2421 = vmatprep.subr.bf16.mxu0 (!%p344_p9), %v2631_v1  ;;  %v2649_v3 = vld [vmem:[%s3510_s3] sm:$0xff] (!%p344_p9)   ;;  %v2650_v4 = vld [vmem:[%s3510_s3 + $0x8] sm:$0xff] (!%p344_p9)   ;;  %v2652_v22 = vld [vmem:[%s3510_s3 + $0x18] sm:$0xff] (!%p344_p9)   ;;  %vm2035_vm2 = vcmask (!%p344_p9), 130048  }
  0x12   : > { %2422 = vmatpush3.bf16.msra.mxu0 (!%p344_p9), %v2631_v1  ;;  %2457 = vmatprep.subr.bf16.mxu1 (!%p344_p9), %v2649_v3  ;;  %v2653_v23 = vld [vmem:[%s3510_s3 + $0x20] sm:$0xff] (!%p344_p9)   ;;  %v2654_v24 = vld [vmem:[%s3510_s3 + $0x28] sm:$0xff] (!%p344_p9)   ;;  %v2655_v25 = vld [vmem:[%s3510_s3 + $0x30] sm:$0xff] (!%p344_p9)   ;;  %s380_s15 = sand.u32 (!%p344_p9), 1, %s2973_s20  }
  0x13   : > { %2423 = vmatprep.subr.bf16.mxu0 (!%p344_p9), %v2632_v2  ;;  %2458 = vmatpush3.bf16.msra.mxu1 (!%p344_p9), %v2649_v3  ;;  %v2656_v26 = vld [vmem:[%s3510_s3 + $0x38] sm:$0xff] (!%p344_p9)   ;;  %v2657_v27 = vld [vmem:[%s3512_s5] sm:$0xff] (!%p344_p9)   ;;  %v2658_v28 = vld [vmem:[%s3512_s5 + $0x8] sm:$0xff] (!%p344_p9)   ;;  %s2229_s16 = sshll.u32 (!%p344_p9), %s380_s15, 1  ;;  %s2152_s26 = scalar_lea.sflag (!%p344_p9), [#allocation4], %s380_s15 }
  0x14   : > { %2459 = vmatprep.subr.bf16.mxu1 (!%p344_p9), %v2650_v4  ;;  %v2659_v29 = vld [vmem:[%s3512_s5 + $0x10] sm:$0xff] (!%p344_p9)   ;;  %v3177_v30 = vld [vmem:[%s3509_s2] ss:$0 sm:$0xff] (!%p344_p9)  ;;  %s382_s17 = scalar_lea.vmem (!%p344_p9), [#allocation3], %s2229_s16 }
  0x16   : > { %2424 = vmatpush3.bf16.msra.mxu0 (!%p344_p9), %v2632_v2 }
  0x17   : > { %2460 = vmatpush3.bf16.msra.mxu1 (!%p344_p9), %v2650_v4  ;;  %2505 = vmatprep.subr.bf16.mxu0 (!%p344_p9), %v2657_v27 }
  0x18   : > { %s385_s18 = scalar_select %p384_p10, %s3097_s13, 63  ;;  %2461 = vmatprep.subr.bf16.mxu1 %v2651_v21 }
  0x1a   : > { %s2231_s10 = sshll.u32 %s385_s18, 2  ;;  %s2166_s18 = sshll.u32 %s382_s17, 4  ;;  %s3467_s18 = int_to_ptr.vmem [resolvable:$true] %s2166_s18 }
  0x1b   : > { %s3113_s12 = scalar_lea.vmem %s3507_s0, %s2231_s10  ;;  %2462 = vmatpush3.bf16.msra.mxu1 %v2651_v21  ;;  %s3465_s10 = scalar_lea.hbm %s3518_s11, %s3097_s13 }
  0x1c   : > { %v2633_v5 = vld [vmem:[%s3113_s12] sm:$0xff]   ;;  %v2634_v6 = vld [vmem:[%s3113_s12 + $0x8] sm:$0xff]   ;;  %v2635_v7 = vld [vmem:[%s3113_s12 + $0x10] sm:$0xff]   ;;  %2463 = vmatprep.subr.bf16.mxu1 %v2652_v22  ;;  %s2919_s30 = scalar_lea.vmem %s3467_s18, 32 }
  0x1d   : > { %2425 = vmatprep.mubr.msk.bf16.mxu0 %vm525_vm0, %v2633_v5  ;;  %v2636_v8 = vld [vmem:[%s3113_s12 + $0x18] sm:$0xff]   ;;  %v2637_v9 = vld [vmem:[%s3113_s12 + $0x20] sm:$0xff]   ;;  %v2638_v10 = vld [vmem:[%s3113_s12 + $0x28] sm:$0xff]   ;;  %p2920_p11 = scmp.ne.s32.totalorder %s3467_s18, %s2919_s30 }
  0x1e   : > { %2426 = vmatmul.mubr.msk.bf16.vlgmr.msra.gmra.mrb[0].mxu0 %vm525_vm0, %v2634_v6  ;;  %v2639_v11 = vld [vmem:[%s3113_s12 + $0x30] sm:$0xff]   ;;  %v2640_v12 = vld [vmem:[%s3113_s12 + $0x38] sm:$0xff]   ;;  %v2641_v13 = vld [vmem:[%s3113_s12 + $0x40] sm:$0xff]  }
  0x1f   : > { %2429 = vmatprep.mubr.msk.bf16.mxu0 %vm525_vm0, %v2635_v7  ;;  %v2642_v14 = vld [vmem:[%s3113_s12 + $0x48] sm:$0xff]   ;;  %v2643_v15 = vld [vmem:[%s3113_s12 + $0x50] sm:$0xff]   ;;  %v2644_v16 = vld [vmem:[%s3113_s12 + $0x58] sm:$0xff]   ;;  %2464 = vmatpush3.bf16.msra.mxu1 %v2652_v22  ;;  %p2921_p12 = pnand %p2920_p11, %p3084_p5 }
  0x20   : > { %v2645_v17 = vld [vmem:[%s3113_s12 + $0x60] sm:$0xff]   ;;  %v2646_v18 = vld [vmem:[%s3113_s12 + $0x68] sm:$0xff]   ;;  %v2647_v19 = vld [vmem:[%s3113_s12 + $0x70] sm:$0xff]   ;;  %2465 = vmatprep.subr.bf16.mxu1 %v2653_v23  ;;  %2506 = vmatpush3.bf16.msra.mxu0 %v2657_v27 }
  0x21   : > { %v2648_v20 = vld [vmem:[%s3113_s12 + $0x78] sm:$0xff]   ;;  %2507 = vmatprep.subr.bf16.mxu0 %v2658_v28  ;;  %p2922_p13 = pneg %p2921_p12  ;;  %s2985_s12 = smov [#allocation3]  }
  0x22   : > { %s2923_s14 = sshll.u32 %s2985_s12, 4  ;;  %s2924_s14 = int_to_ptr.vmem [resolvable:$false] %s2923_s14 }
  0x23   : > { %2466 = vmatpush3.bf16.msra.mxu1 %v2653_v23  ;;  %s2925_s16 = scalar_lea.vmem %s2924_s14, 64  ;;  %p2926_p0 = scmp.lt.s32.totalorder %s3467_s18, %s2924_s14 }
  0x24   : > { %2467 = vmatprep.subr.bf16.mxu1 %v2654_v24  ;;  %2508 = vmatpush3.bf16.msra.mxu0 %v2658_v28  ;;  %p2927_p1 = scmp.lt.s32.totalorder %s2925_s16, %s2919_s30 }
  0x25   : > { %2509 = vmatprep.subr.bf16.mxu0 %v2659_v29 }
  0x26   : > { %2430 = vmatmul.mubr.msk.bf16.gmra.mrb[4].mxu0 %vm525_vm0, %v2636_v8  ;;  %p2928_p2 = por %p2927_p1, %p2926_p0 }
  0x27   : > { %2433 = vmatprep.mubr.msk.bf16.mxu0 %vm525_vm0, %v2637_v9  ;;  %2468 = vmatpush3.bf16.msra.mxu1 %v2654_v24 }
  0x28   : > { %2469 = vmatprep.subr.bf16.mxu1 %v2655_v25  ;;  %2510 = vmatpush3.bf16.msra.mxu0 %v2659_v29  ;;  %p2929_p3 = pnand %p2928_p2, %p2922_p13 }
  0x2b   : > { %2470 = vmatpush3.bf16.msra.mxu1 %v2655_v25 }
  0x2c   : > { %2471 = vmatprep.subr.bf16.mxu1 %v2656_v26 }
  0x2e   : > { %2434 = vmatmul.mubr.msk.bf16.gmra.mrb[8].mxu0 %vm525_vm0, %v2638_v10 }
  0x2f   : > { %2437 = vmatprep.mubr.msk.bf16.mxu0 %vm525_vm0, %v2639_v11  ;;  %2472 = vmatpush3.bf16.msra.mxu1 %v2656_v26 }
  0x36   : > { %2438 = vmatmul.mubr.msk.bf16.gmra.mrb[12].mxu0 %vm525_vm0, %v2640_v12 }
  0x37   : > { %2441 = vmatprep.mubr.msk.bf16.mxu0 %vm525_vm0, %v2641_v13 }
  0x3e   : > { %2442 = vmatmul.mubr.msk.bf16.gmra.mrb[16].mxu0 %vm525_vm0, %v2642_v14 }
  0x3f   : > { %2445 = vmatprep.mubr.msk.bf16.mxu0 %vm525_vm0, %v2643_v15 }
  0x46   : > { %2446 = vmatmul.mubr.msk.bf16.gmra.mrb[20].mxu0 %vm525_vm0, %v2644_v16 }
  0x47   : > { %2449 = vmatprep.mubr.msk.bf16.mxu0 %vm525_vm0, %v2645_v17 }
  0x4e   : > { %2450 = vmatmul.mubr.msk.bf16.gmra.mrb[24].mxu0 %vm525_vm0, %v2646_v18 }
  0x4f   : > { %2453 = vmatprep.mubr.msk.bf16.mxu0 %vm525_vm0, %v2647_v19 }
  0x56   : > { %2454 = vmatmul.mubr.msk.bf16.gmra.mrb[28].mxu0 %vm525_vm0, %v2648_v20 }
  0xf1   : > { %v2427_v31 = vpop.f32.mrb[0].mxu0 }
  0xf2   : > { %v617_v32 = vadd.f32 %v2427_v31, %v3177_v30  ;;  %v608_v33 = vpop.f32.mrb[1].mxu0 }
  0xf3   : > { %v609_v34 = vadd.f32 %v3177_v30, %v608_v33  ;;  %v2428_v35 = vpop.f32.mrb[2].mxu0 }
  0xf4   : > { %v737_v36 = vmul.f32 0.5, %v617_v32  ;;  %v620_v37 = vadd.f32 %v2428_v35, %v3177_v30  ;;  %v611_v38 = vpop.f32.mrb[3].mxu0 }
  0xf5   : > { %v735_v39 = vmul.f32 0.5, %v609_v34  ;;  %v612_v40 = vadd.f32 %v3177_v30, %v611_v38 }
  0xf6   : > { %2663 = vtanh.f32 %v737_v36  ;;  %v738_v41 = vmul.f32 0.5, %v620_v37 }
  0xf7   : > { %2665 = vtanh.f32 %v735_v39  ;;  %v736_v42 = vmul.f32 0.5, %v612_v40 }
  0xf8   : > { %2667 = vtanh.f32 %v738_v41 }
  0xf9   : > { %2669 = vtanh.f32 %v736_v42  ;;  %v2431_v43 = vpop.f32.mrb[4].mxu0 }
  0xfa   : > { %v633_v44 = vadd.f32 %v2431_v43, %v3177_v30  ;;  %v624_v45 = vpop.f32.mrb[5].mxu0 }
  0xfb   : > { %v625_v46 = vadd.f32 %v3177_v30, %v624_v45  ;;  %v2432_v47 = vpop.f32.mrb[6].mxu0 }
  0xfc   : > { %v741_v48 = vmul.f32 0.5, %v633_v44  ;;  %v636_v49 = vadd.f32 %v2432_v47, %v3177_v30  ;;  %v627_v50 = vpop.f32.mrb[7].mxu0 }
  0xfd   : > { %v739_v51 = vmul.f32 0.5, %v625_v46  ;;  %v628_v52 = vadd.f32 %v3177_v30, %v627_v50 }
  0xfe   : > { %2671 = vtanh.f32 %v741_v48  ;;  %v742_v53 = vmul.f32 0.5, %v636_v49 }
  0xff   : > { %2673 = vtanh.f32 %v739_v51  ;;  %v740_v54 = vmul.f32 0.5, %v628_v52 }
 0x100   : > { %v2664_v55 = vpop.eup %2663  ;;  %2675 = vtanh.f32 %v742_v53 }
 0x101   : > { %v2666_v56 = vpop.eup %2665  ;;  %v801_v57 = vmul.f32 0.5, %v2664_v55  ;;  %2677 = vtanh.f32 %v740_v54  ;;  %v2435_v58 = vpop.f32.mrb[8].mxu0 }
 0x102   : > { %v2668_v59 = vpop.eup %2667  ;;  %v649_v60 = vadd.f32 %v2435_v58, %v3177_v30  ;;  %v640_v61 = vpop.f32.mrb[9].mxu0  ;;  %v799_v62 = vmul.f32 0.5, %v2666_v56 }
 0x103   : > { %v2670_v63 = vpop.eup %2669  ;;  %v802_v0 = vmul.f32 0.5, %v2668_v59  ;;  %v641_v1 = vadd.f32 %v3177_v30, %v640_v61  ;;  %v2436_v2 = vpop.f32.mrb[10].mxu0  ;;  %v833_v7 = vadd.f32 0.5, %v801_v57 }
 0x104   : > { %v745_v3 = vmul.f32 0.5, %v649_v60  ;;  %v652_v4 = vadd.f32 %v2436_v2, %v3177_v30  ;;  %v643_v5 = vpop.f32.mrb[11].mxu0  ;;  %v800_v6 = vmul.f32 0.5, %v2670_v63  ;;  %v831_v12 = vadd.f32 0.5, %v799_v62 }
 0x105   : > { %v834_v8 = vadd.f32 0.5, %v802_v0  ;;  %v743_v9 = vmul.f32 0.5, %v641_v1  ;;  %v644_v10 = vadd.f32 %v3177_v30, %v643_v5 }
 0x106   : > { %2679 = vtanh.f32 %v745_v3  ;;  %v746_v11 = vmul.f32 0.5, %v652_v4  ;;  %v832_v13 = vadd.f32 0.5, %v800_v6 }
 0x107   : > { %2681 = vtanh.f32 %v743_v9  ;;  %v744_v14 = vmul.f32 0.5, %v644_v10  ;;  %v864_v15 = vpack.c.bf16 %v834_v8, %v833_v7 }
 0x108   : > { %v2672_v16 = vpop.eup %2671  ;;  %2683 = vtanh.f32 %v746_v11  ;;  %v863_v17 = vpack.c.bf16 %v832_v13, %v831_v12 }
 0x109   : > { %v2674_v18 = vpop.eup %2673  ;;  %v805_v19 = vmul.f32 0.5, %v2672_v16  ;;  %2685 = vtanh.f32 %v744_v14  ;;  %v2439_v20 = vpop.f32.mrb[12].mxu0 }
 0x10a   : > { %v2676_v21 = vpop.eup %2675  ;;  %v803_v22 = vmul.f32 0.5, %v2674_v18  ;;  %v665_v23 = vadd.f32 %v2439_v20, %v3177_v30  ;;  %v656_v24 = vpop.f32.mrb[13].mxu0  ;;  %2473 = vmatprep.mubr.bf16.mxu1 %v863_v17 }
 0x10b   : > { %v2678_v25 = vpop.eup %2677  ;;  %v806_v26 = vmul.f32 0.5, %v2676_v21  ;;  %v657_v27 = vadd.f32 %v3177_v30, %v656_v24  ;;  %v2440_v28 = vpop.f32.mrb[14].mxu0  ;;  %2474 = vmatmul.mubr.bf16.vlgmr.msra.gmra.mrb[0].mxu1 %v864_v15  ;;  %v837_v34 = vadd.f32 0.5, %v805_v19 }
 0x10c   : > { %v804_v29 = vmul.f32 0.5, %v2678_v25  ;;  %v749_v31 = vmul.f32 0.5, %v665_v23  ;;  %v668_v32 = vadd.f32 %v2440_v28, %v3177_v30  ;;  %v659_v33 = vpop.f32.mrb[15].mxu0  ;;  %v835_v38 = vadd.f32 0.5, %v803_v22 }
 0x10d   : > { %v838_v35 = vadd.f32 0.5, %v806_v26  ;;  %v747_v36 = vmul.f32 0.5, %v657_v27  ;;  %v660_v37 = vadd.f32 %v3177_v30, %v659_v33 }
 0x10e   : > { %v836_v39 = vadd.f32 0.5, %v804_v29  ;;  %2687 = vtanh.f32 %v749_v31  ;;  %v750_v40 = vmul.f32 0.5, %v668_v32 }
 0x10f   : > { %2689 = vtanh.f32 %v747_v36  ;;  %v748_v41 = vmul.f32 0.5, %v660_v37  ;;  %v866_v42 = vpack.c.bf16 %v838_v35, %v837_v34 }
 0x110   : > { %v2680_v43 = vpop.eup %2679  ;;  %2691 = vtanh.f32 %v750_v40  ;;  %v865_v44 = vpack.c.bf16 %v836_v39, %v835_v38 }
 0x111   : > { %v2682_v45 = vpop.eup %2681  ;;  %v809_v46 = vmul.f32 0.5, %v2680_v43  ;;  %2693 = vtanh.f32 %v748_v41  ;;  %v2443_v47 = vpop.f32.mrb[16].mxu0 }
 0x112   : > { %v2684_v48 = vpop.eup %2683  ;;  %v807_v49 = vmul.f32 0.5, %v2682_v45  ;;  %v681_v50 = vadd.f32 %v2443_v47, %v3177_v30  ;;  %v672_v51 = vpop.f32.mrb[17].mxu0  ;;  %2477 = vmatprep.mubr.bf16.mxu1 %v865_v44 }
 0x113   : > { %v2686_v52 = vpop.eup %2685  ;;  %v810_v53 = vmul.f32 0.5, %v2684_v48  ;;  %v673_v54 = vadd.f32 %v3177_v30, %v672_v51  ;;  %v2444_v55 = vpop.f32.mrb[18].mxu0  ;;  %2478 = vmatmul.mubr.bf16.gmra.mrb[4].mxu1 %v866_v42  ;;  %v841_v60 = vadd.f32 0.5, %v809_v46 }
 0x114   : > { %v808_v56 = vmul.f32 0.5, %v2686_v52  ;;  %v753_v57 = vmul.f32 0.5, %v681_v50  ;;  %v684_v58 = vadd.f32 %v2444_v55, %v3177_v30  ;;  %v675_v59 = vpop.f32.mrb[19].mxu0  ;;  %v839_v0 = vadd.f32 0.5, %v807_v49 }
 0x115   : > { %v842_v61 = vadd.f32 0.5, %v810_v53  ;;  %v751_v62 = vmul.f32 0.5, %v673_v54  ;;  %v676_v63 = vadd.f32 %v3177_v30, %v675_v59 }
 0x116   : > { %v840_v1 = vadd.f32 0.5, %v808_v56  ;;  %2695 = vtanh.f32 %v753_v57  ;;  %v754_v2 = vmul.f32 0.5, %v684_v58 }
 0x117   : > { %2697 = vtanh.f32 %v751_v62  ;;  %v752_v3 = vmul.f32 0.5, %v676_v63  ;;  %v868_v4 = vpack.c.bf16 %v842_v61, %v841_v60 }
 0x118   : > { %v2688_v5 = vpop.eup %2687  ;;  %2699 = vtanh.f32 %v754_v2  ;;  %v867_v6 = vpack.c.bf16 %v840_v1, %v839_v0 }
 0x119   : > { %v2690_v7 = vpop.eup %2689  ;;  %v813_v8 = vmul.f32 0.5, %v2688_v5  ;;  %2701 = vtanh.f32 %v752_v3  ;;  %v2447_v9 = vpop.f32.mrb[20].mxu0 }
 0x11a   : > { %v2692_v10 = vpop.eup %2691  ;;  %v811_v11 = vmul.f32 0.5, %v2690_v7  ;;  %v697_v12 = vadd.f32 %v2447_v9, %v3177_v30  ;;  %v688_v13 = vpop.f32.mrb[21].mxu0  ;;  %2481 = vmatprep.mubr.bf16.mxu1 %v867_v6 }
 0x11b   : > { %v2694_v14 = vpop.eup %2693  ;;  %v814_v15 = vmul.f32 0.5, %v2692_v10  ;;  %v689_v16 = vadd.f32 %v3177_v30, %v688_v13  ;;  %v2448_v17 = vpop.f32.mrb[22].mxu0  ;;  %2482 = vmatmul.mubr.bf16.gmra.mrb[8].mxu1 %v868_v4  ;;  %v845_v22 = vadd.f32 0.5, %v813_v8 }
 0x11c   : > { %v812_v18 = vmul.f32 0.5, %v2694_v14  ;;  %v757_v19 = vmul.f32 0.5, %v697_v12  ;;  %v700_v20 = vadd.f32 %v2448_v17, %v3177_v30  ;;  %v691_v21 = vpop.f32.mrb[23].mxu0  ;;  %v843_v26 = vadd.f32 0.5, %v811_v11 }
 0x11d   : > { %v846_v23 = vadd.f32 0.5, %v814_v15  ;;  %v755_v24 = vmul.f32 0.5, %v689_v16  ;;  %v692_v25 = vadd.f32 %v3177_v30, %v691_v21 }
 0x11e   : > { %v844_v27 = vadd.f32 0.5, %v812_v18  ;;  %2703 = vtanh.f32 %v757_v19  ;;  %v758_v28 = vmul.f32 0.5, %v700_v20 }
 0x11f   : > { %2705 = vtanh.f32 %v755_v24  ;;  %v756_v29 = vmul.f32 0.5, %v692_v25  ;;  %v870_v31 = vpack.c.bf16 %v846_v23, %v845_v22 }
 0x120   : > { %v2696_v32 = vpop.eup %2695  ;;  %2707 = vtanh.f32 %v758_v28  ;;  %v869_v33 = vpack.c.bf16 %v844_v27, %v843_v26 }
 0x121   : > { %v2698_v34 = vpop.eup %2697  ;;  %v817_v35 = vmul.f32 0.5, %v2696_v32  ;;  %2709 = vtanh.f32 %v756_v29  ;;  %v2451_v36 = vpop.f32.mrb[24].mxu0 }
 0x122   : > { %v2700_v37 = vpop.eup %2699  ;;  %v815_v38 = vmul.f32 0.5, %v2698_v34  ;;  %v713_v39 = vadd.f32 %v2451_v36, %v3177_v30  ;;  %2485 = vmatprep.mubr.bf16.mxu1 %v869_v33  ;;  %v704_v40 = vpop.f32.mrb[25].mxu0 }
 0x123   : > { %v2702_v41 = vpop.eup %2701  ;;  %v818_v42 = vmul.f32 0.5, %v2700_v37  ;;  %v705_v43 = vadd.f32 %v3177_v30, %v704_v40  ;;  %2486 = vmatmul.mubr.bf16.gmra.mrb[12].mxu1 %v870_v31  ;;  %v2452_v44 = vpop.f32.mrb[26].mxu0  ;;  %v849_v49 = vadd.f32 0.5, %v817_v35 }
 0x124   : > { %v816_v45 = vmul.f32 0.5, %v2702_v41  ;;  %v761_v46 = vmul.f32 0.5, %v713_v39  ;;  %v716_v47 = vadd.f32 %v2452_v44, %v3177_v30  ;;  %v707_v48 = vpop.f32.mrb[27].mxu0  ;;  %v847_v53 = vadd.f32 0.5, %v815_v38 }
 0x125   : > { %v850_v50 = vadd.f32 0.5, %v818_v42  ;;  %v759_v51 = vmul.f32 0.5, %v705_v43  ;;  %v708_v52 = vadd.f32 %v3177_v30, %v707_v48 }
 0x126   : > { %v848_v54 = vadd.f32 0.5, %v816_v45  ;;  %2711 = vtanh.f32 %v761_v46  ;;  %v762_v55 = vmul.f32 0.5, %v716_v47 }
 0x127   : > { %2713 = vtanh.f32 %v759_v51  ;;  %v760_v56 = vmul.f32 0.5, %v708_v52  ;;  %v872_v57 = vpack.c.bf16 %v850_v50, %v849_v49  ;;  %v2660_v49 = vld [vmem:[%s3512_s5 + $0x18] sm:$0xff]   ;;  %v2661_v50 = vld [vmem:[%s3514_s7] sm:$0xff]   ;;  %v2662_v51 = vld [vmem:[%s3514_s7 + $0x8] sm:$0xff]  }
 0x128   : > { %v2704_v58 = vpop.eup %2703  ;;  %2715 = vtanh.f32 %v762_v55  ;;  %v871_v59 = vpack.c.bf16 %v848_v54, %v847_v53  ;;  %2511 = vmatprep.subr.bf16.mxu0 %v2660_v49  ;;  %2545 = vmatprep.subr.bf16.mxu1 %v2661_v50  ;;  %v3223_v52 = vld [vmem:[%s3511_s4] ss:$0 sm:$0xff] }
 0x129   : > { %v2706_v60 = vpop.eup %2705  ;;  %v821_v61 = vmul.f32 0.5, %v2704_v58  ;;  %2717 = vtanh.f32 %v760_v56  ;;  %v2455_v62 = vpop.f32.mrb[28].mxu0  ;;  %2512 = vmatpush3.bf16.msra.mxu0 %v2660_v49  ;;  %2546 = vmatpush3.bf16.msra.mxu1 %v2661_v50 }
 0x12a   : > { %v2708_v63 = vpop.eup %2707  ;;  %v819_v0 = vmul.f32 0.5, %v2706_v60  ;;  %2489 = vmatprep.mubr.bf16.mxu1 %v871_v59  ;;  %v729_v1 = vadd.f32 %v2455_v62, %v3177_v30  ;;  %v720_v2 = vpop.f32.mrb[29].mxu0  ;;  %2547 = vmatprep.subr.bf16.mxu1 %v2662_v51 }
 0x12b   : > { %v2710_v3 = vpop.eup %2709  ;;  %v853_v4 = vadd.f32 0.5, %v821_v61  ;;  %v822_v5 = vmul.f32 0.5, %v2708_v63  ;;  %2490 = vmatmul.mubr.bf16.gmra.mrb[16].mxu1 %v872_v57  ;;  %v721_v6 = vadd.f32 %v3177_v30, %v720_v2  ;;  %v2456_v7 = vpop.f32.mrb[30].mxu0 }
 0x12c   : > { %v851_v8 = vadd.f32 0.5, %v819_v0  ;;  %v820_v9 = vmul.f32 0.5, %v2710_v3  ;;  %v765_v10 = vmul.f32 0.5, %v729_v1  ;;  %v732_v11 = vadd.f32 %v2456_v7, %v3177_v30  ;;  %v723_v12 = vpop.f32.mrb[31].mxu0 }
 0x12d   : > { %v854_v13 = vadd.f32 0.5, %v822_v5  ;;  %v763_v14 = vmul.f32 0.5, %v721_v6  ;;  %v724_v15 = vadd.f32 %v3177_v30, %v723_v12  ;;  %2548 = vmatpush3.bf16.msra.mxu1 %v2662_v51 }
 0x12e   : > { %v852_v16 = vadd.f32 0.5, %v820_v9  ;;  %2719 = vtanh.f32 %v765_v10  ;;  %v766_v17 = vmul.f32 0.5, %v732_v11 }
 0x12f   : > { %2721 = vtanh.f32 %v763_v14  ;;  %v874_v18 = vpack.c.bf16 %v854_v13, %v853_v4  ;;  %v764_v19 = vmul.f32 0.5, %v724_v15 }
 0x130   : > { %v2712_v20 = vpop.eup %2711  ;;  %v873_v21 = vpack.c.bf16 %v852_v16, %v851_v8  ;;  %2723 = vtanh.f32 %v766_v17 }
 0x131   : > { %v2714_v22 = vpop.eup %2713  ;;  %v825_v23 = vmul.f32 0.5, %v2712_v20  ;;  %2725 = vtanh.f32 %v764_v19 }
 0x132   : > { %v2716_v24 = vpop.eup %2715  ;;  %v823_v25 = vmul.f32 0.5, %v2714_v22  ;;  %2493 = vmatprep.mubr.bf16.mxu1 %v873_v21 }
 0x133   : > { %v2718_v26 = vpop.eup %2717  ;;  %v857_v27 = vadd.f32 0.5, %v825_v23  ;;  %v826_v28 = vmul.f32 0.5, %v2716_v24  ;;  %2494 = vmatmul.mubr.bf16.gmra.mrb[20].mxu1 %v874_v18 }
 0x134   : > { %v855_v30 = vadd.f32 0.5, %v823_v25  ;;  %v824_v29 = vmul.f32 0.5, %v2718_v26 }
 0x135   : > { %v858_v31 = vadd.f32 0.5, %v826_v28 }
 0x136   : > { %v856_v32 = vadd.f32 0.5, %v824_v29 }
 0x137   : > { %v876_v33 = vpack.c.bf16 %v858_v31, %v857_v27 }
 0x138   : > { %v2720_v34 = vpop.eup %2719  ;;  %v875_v35 = vpack.c.bf16 %v856_v32, %v855_v30 }
 0x139   : > { %v2722_v36 = vpop.eup %2721  ;;  %v829_v37 = vmul.f32 0.5, %v2720_v34 }
 0x13a   : > { %v2724_v38 = vpop.eup %2723  ;;  %v827_v39 = vmul.f32 0.5, %v2722_v36  ;;  %2497 = vmatprep.mubr.bf16.mxu1 %v875_v35 }
 0x13b   : > { %v2726_v40 = vpop.eup %2725  ;;  %v861_v41 = vadd.f32 0.5, %v829_v37  ;;  %v830_v42 = vmul.f32 0.5, %v2724_v38  ;;  %2498 = vmatmul.mubr.bf16.gmra.mrb[24].mxu1 %v876_v33 }
 0x13c   : > { %v859_v43 = vadd.f32 0.5, %v827_v39  ;;  %v828_v44 = vmul.f32 0.5, %v2726_v40 }
 0x13d   : > { %v862_v45 = vadd.f32 0.5, %v830_v42 }
 0x13e   : > { %v860_v46 = vadd.f32 0.5, %v828_v44 }
 0x13f   : > { %v878_v47 = vpack.c.bf16 %v862_v45, %v861_v41 }
 0x140   : > { %v877_v48 = vpack.c.bf16 %v860_v46, %v859_v43 }
 0x142   : > { %2501 = vmatprep.mubr.bf16.mxu1 %v877_v48 }
 0x143   : > { %2502 = vmatmul.mubr.bf16.gmra.mrb[28].mxu1 %v878_v47 }
 0x1de   : > { %v2475_v53 = vpop.f32.mrb[0].mxu1 }
 0x1df   : > { %v993_v54 = vadd.f32 %v2475_v53, %v3223_v52  ;;  %v984_v55 = vpop.f32.mrb[1].mxu1 }
 0x1e0   : > { %v985_v56 = vadd.f32 %v3223_v52, %v984_v55  ;;  %v2476_v57 = vpop.f32.mrb[2].mxu1 }
 0x1e1   : > { %v1113_v58 = vmul.f32 0.5, %v993_v54  ;;  %v996_v59 = vadd.f32 %v2476_v57, %v3223_v52  ;;  %v987_v60 = vpop.f32.mrb[3].mxu1 }
 0x1e2   : > { %v1111_v61 = vmul.f32 0.5, %v985_v56  ;;  %v988_v62 = vadd.f32 %v3223_v52, %v987_v60 }
 0x1e3   : > { %2727 = vtanh.f32 %v1113_v58  ;;  %v1114_v63 = vmul.f32 0.5, %v996_v59 }
 0x1e4   : > { %2729 = vtanh.f32 %v1111_v61  ;;  %v1112_v0 = vmul.f32 0.5, %v988_v62 }
 0x1e5   : > { %2731 = vtanh.f32 %v1114_v63 }
 0x1e6   : > { %2733 = vtanh.f32 %v1112_v0  ;;  %v2479_v1 = vpop.f32.mrb[4].mxu1 }
 0x1e7   : > { %v1009_v2 = vadd.f32 %v2479_v1, %v3223_v52  ;;  %v1000_v3 = vpop.f32.mrb[5].mxu1 }
 0x1e8   : > { %v1001_v4 = vadd.f32 %v3223_v52, %v1000_v3  ;;  %v2480_v5 = vpop.f32.mrb[6].mxu1 }
 0x1e9   : > { %v1117_v6 = vmul.f32 0.5, %v1009_v2  ;;  %v1012_v7 = vadd.f32 %v2480_v5, %v3223_v52  ;;  %v1003_v8 = vpop.f32.mrb[7].mxu1 }
 0x1ea   : > { %v1115_v9 = vmul.f32 0.5, %v1001_v4  ;;  %v1004_v10 = vadd.f32 %v3223_v52, %v1003_v8 }
 0x1eb   : > { %2735 = vtanh.f32 %v1117_v6  ;;  %v1118_v11 = vmul.f32 0.5, %v1012_v7 }
 0x1ec   : > { %2737 = vtanh.f32 %v1115_v9  ;;  %v1116_v12 = vmul.f32 0.5, %v1004_v10 }
 0x1ed   : > { %v2728_v13 = vpop.eup %2727  ;;  %2739 = vtanh.f32 %v1118_v11 }
 0x1ee   : > { %v2730_v14 = vpop.eup %2729  ;;  %v1177_v15 = vmul.f32 0.5, %v2728_v13  ;;  %2741 = vtanh.f32 %v1116_v12  ;;  %v2483_v16 = vpop.f32.mrb[8].mxu1 }
 0x1ef   : > { %v2732_v17 = vpop.eup %2731  ;;  %v1175_v18 = vmul.f32 0.5, %v2730_v14  ;;  %v1025_v19 = vadd.f32 %v2483_v16, %v3223_v52  ;;  %v1016_v20 = vpop.f32.mrb[9].mxu1 }
 0x1f0   : > { %v2734_v21 = vpop.eup %2733  ;;  %v1178_v22 = vmul.f32 0.5, %v2732_v17  ;;  %v1017_v23 = vadd.f32 %v3223_v52, %v1016_v20  ;;  %v2484_v24 = vpop.f32.mrb[10].mxu1  ;;  %v1209_v30 = vadd.f32 0.5, %v1177_v15 }
 0x1f1   : > { %v1176_v25 = vmul.f32 0.5, %v2734_v21  ;;  %v1121_v26 = vmul.f32 0.5, %v1025_v19  ;;  %v1028_v27 = vadd.f32 %v2484_v24, %v3223_v52  ;;  %v1019_v28 = vpop.f32.mrb[11].mxu1  ;;  %v1207_v33 = vadd.f32 0.5, %v1175_v18 }
 0x1f2   : > { %v1210_v29 = vadd.f32 0.5, %v1178_v22  ;;  %v1119_v31 = vmul.f32 0.5, %v1017_v23  ;;  %v1020_v32 = vadd.f32 %v3223_v52, %v1019_v28 }
 0x1f3   : > { %v1208_v34 = vadd.f32 0.5, %v1176_v25  ;;  %2743 = vtanh.f32 %v1121_v26  ;;  %v1122_v35 = vmul.f32 0.5, %v1028_v27 }
 0x1f4   : > { %v1240_v36 = vpack.c.bf16 %v1210_v29, %v1209_v30  ;;  %2745 = vtanh.f32 %v1119_v31  ;;  %v1120_v37 = vmul.f32 0.5, %v1020_v32 }
 0x1f5   : > { %v2736_v38 = vpop.eup %2735  ;;  %v1239_v39 = vpack.c.bf16 %v1208_v34, %v1207_v33  ;;  %2747 = vtanh.f32 %v1122_v35 }
 0x1f6   : > { %v2738_v40 = vpop.eup %2737  ;;  %v1181_v41 = vmul.f32 0.5, %v2736_v38  ;;  %2749 = vtanh.f32 %v1120_v37  ;;  %v2487_v42 = vpop.f32.mrb[12].mxu1 }
 0x1f7   : > { %v2740_v43 = vpop.eup %2739  ;;  %v1179_v44 = vmul.f32 0.5, %v2738_v40  ;;  %v1041_v45 = vadd.f32 %v2487_v42, %v3223_v52  ;;  %v1032_v46 = vpop.f32.mrb[13].mxu1  ;;  %2513 = vmatprep.mubr.msk.bf16.mxu0 %vm1294_vm1, %v1239_v39 }
 0x1f8   : > { %v2742_v47 = vpop.eup %2741  ;;  %v1182_v48 = vmul.f32 0.5, %v2740_v43  ;;  %v1033_v49 = vadd.f32 %v3223_v52, %v1032_v46  ;;  %v2488_v50 = vpop.f32.mrb[14].mxu1  ;;  %2514 = vmatmul.mubr.msk.bf16.vlgmr.msra.gmra.mrb[32].mxu0 %vm1294_vm1, %v1240_v36  ;;  %v1213_v56 = vadd.f32 0.5, %v1181_v41 }
 0x1f9   : > { %v1180_v51 = vmul.f32 0.5, %v2742_v47  ;;  %v1125_v53 = vmul.f32 0.5, %v1041_v45  ;;  %v1044_v54 = vadd.f32 %v2488_v50, %v3223_v52  ;;  %v1035_v55 = vpop.f32.mrb[15].mxu1  ;;  %v1211_v60 = vadd.f32 0.5, %v1179_v44 }
 0x1fa   : > { %v1214_v57 = vadd.f32 0.5, %v1182_v48  ;;  %v1123_v58 = vmul.f32 0.5, %v1033_v49  ;;  %v1036_v59 = vadd.f32 %v3223_v52, %v1035_v55 }
 0x1fb   : > { %v1212_v61 = vadd.f32 0.5, %v1180_v51  ;;  %2751 = vtanh.f32 %v1125_v53  ;;  %v1126_v62 = vmul.f32 0.5, %v1044_v54 }
 0x1fc   : > { %v1242_v63 = vpack.c.bf16 %v1214_v57, %v1213_v56  ;;  %2753 = vtanh.f32 %v1123_v58  ;;  %v1124_v0 = vmul.f32 0.5, %v1036_v59 }
 0x1fd   : > { %v2744_v1 = vpop.eup %2743  ;;  %v1241_v2 = vpack.c.bf16 %v1212_v61, %v1211_v60  ;;  %2755 = vtanh.f32 %v1126_v62 }
 0x1fe   : > { %v2746_v3 = vpop.eup %2745  ;;  %v1185_v4 = vmul.f32 0.5, %v2744_v1  ;;  %2757 = vtanh.f32 %v1124_v0  ;;  %v2491_v5 = vpop.f32.mrb[16].mxu1 }
 0x1ff   : > { %v2748_v6 = vpop.eup %2747  ;;  %v1183_v7 = vmul.f32 0.5, %v2746_v3  ;;  %v1057_v8 = vadd.f32 %v2491_v5, %v3223_v52  ;;  %v1048_v9 = vpop.f32.mrb[17].mxu1  ;;  %2517 = vmatprep.mubr.msk.bf16.mxu0 %vm1294_vm1, %v1241_v2 }
 0x200   : > { %v2750_v10 = vpop.eup %2749  ;;  %v1186_v11 = vmul.f32 0.5, %v2748_v6  ;;  %v1049_v12 = vadd.f32 %v3223_v52, %v1048_v9  ;;  %v2492_v13 = vpop.f32.mrb[18].mxu1  ;;  %2518 = vmatmul.mubr.msk.bf16.gmra.mrb[36].mxu0 %vm1294_vm1, %v1242_v63  ;;  %v1217_v18 = vadd.f32 0.5, %v1185_v4 }
 0x201   : > { %v1184_v14 = vmul.f32 0.5, %v2750_v10  ;;  %v1129_v15 = vmul.f32 0.5, %v1057_v8  ;;  %v1060_v16 = vadd.f32 %v2492_v13, %v3223_v52  ;;  %v1051_v17 = vpop.f32.mrb[19].mxu1  ;;  %v1215_v22 = vadd.f32 0.5, %v1183_v7 }
 0x202   : > { %v1218_v19 = vadd.f32 0.5, %v1186_v11  ;;  %v1127_v20 = vmul.f32 0.5, %v1049_v12  ;;  %v1052_v21 = vadd.f32 %v3223_v52, %v1051_v17 }
 0x203   : > { %v1216_v23 = vadd.f32 0.5, %v1184_v14  ;;  %2759 = vtanh.f32 %v1129_v15  ;;  %v1130_v24 = vmul.f32 0.5, %v1060_v16 }
 0x204   : > { %v1244_v25 = vpack.c.bf16 %v1218_v19, %v1217_v18  ;;  %2761 = vtanh.f32 %v1127_v20  ;;  %v1128_v26 = vmul.f32 0.5, %v1052_v21 }
 0x205   : > { %v2752_v27 = vpop.eup %2751  ;;  %v1243_v28 = vpack.c.bf16 %v1216_v23, %v1215_v22  ;;  %2763 = vtanh.f32 %v1130_v24 }
 0x206   : > { %v2754_v30 = vpop.eup %2753  ;;  %v1189_v29 = vmul.f32 0.5, %v2752_v27  ;;  %2765 = vtanh.f32 %v1128_v26  ;;  %v2495_v31 = vpop.f32.mrb[20].mxu1 }
 0x207   : > { %v2756_v32 = vpop.eup %2755  ;;  %v1187_v33 = vmul.f32 0.5, %v2754_v30  ;;  %v1073_v34 = vadd.f32 %v2495_v31, %v3223_v52  ;;  %v1064_v35 = vpop.f32.mrb[21].mxu1  ;;  %2521 = vmatprep.mubr.msk.bf16.mxu0 %vm1294_vm1, %v1243_v28 }
 0x208   : > { %v2758_v36 = vpop.eup %2757  ;;  %v1190_v37 = vmul.f32 0.5, %v2756_v32  ;;  %v1065_v38 = vadd.f32 %v3223_v52, %v1064_v35  ;;  %v2496_v39 = vpop.f32.mrb[22].mxu1  ;;  %2522 = vmatmul.mubr.msk.bf16.gmra.mrb[40].mxu0 %vm1294_vm1, %v1244_v25  ;;  %v1221_v44 = vadd.f32 0.5, %v1189_v29 }
 0x209   : > { %v1188_v40 = vmul.f32 0.5, %v2758_v36  ;;  %v1133_v41 = vmul.f32 0.5, %v1073_v34  ;;  %v1076_v42 = vadd.f32 %v2496_v39, %v3223_v52  ;;  %v1067_v43 = vpop.f32.mrb[23].mxu1  ;;  %v1219_v48 = vadd.f32 0.5, %v1187_v33 }
 0x20a   : > { %v1222_v45 = vadd.f32 0.5, %v1190_v37  ;;  %v1131_v46 = vmul.f32 0.5, %v1065_v38  ;;  %v1068_v47 = vadd.f32 %v3223_v52, %v1067_v43 }
 0x20b   : > { %v1220_v49 = vadd.f32 0.5, %v1188_v40  ;;  %2767 = vtanh.f32 %v1133_v41  ;;  %v1134_v50 = vmul.f32 0.5, %v1076_v42 }
 0x20c   : > { %v1246_v51 = vpack.c.bf16 %v1222_v45, %v1221_v44  ;;  %2769 = vtanh.f32 %v1131_v46  ;;  %v1132_v53 = vmul.f32 0.5, %v1068_v47 }
 0x20d   : > { %v2760_v54 = vpop.eup %2759  ;;  %v1245_v55 = vpack.c.bf16 %v1220_v49, %v1219_v48  ;;  %2771 = vtanh.f32 %v1134_v50 }
 0x20e   : > { %v2762_v56 = vpop.eup %2761  ;;  %v1193_v57 = vmul.f32 0.5, %v2760_v54  ;;  %2773 = vtanh.f32 %v1132_v53  ;;  %v2499_v58 = vpop.f32.mrb[24].mxu1 }
 0x20f   : > { %v2764_v59 = vpop.eup %2763  ;;  %v1191_v60 = vmul.f32 0.5, %v2762_v56  ;;  %v1089_v61 = vadd.f32 %v2499_v58, %v3223_v52  ;;  %2525 = vmatprep.mubr.msk.bf16.mxu0 %vm1294_vm1, %v1245_v55  ;;  %v1080_v62 = vpop.f32.mrb[25].mxu1 }
 0x210   : > { %v2766_v63 = vpop.eup %2765  ;;  %v1194_v0 = vmul.f32 0.5, %v2764_v59  ;;  %v1081_v1 = vadd.f32 %v3223_v52, %v1080_v62  ;;  %2526 = vmatmul.mubr.msk.bf16.gmra.mrb[44].mxu0 %vm1294_vm1, %v1246_v51  ;;  %v2500_v2 = vpop.f32.mrb[26].mxu1  ;;  %v1225_v7 = vadd.f32 0.5, %v1193_v57 }
 0x211   : > { %v1192_v3 = vmul.f32 0.5, %v2766_v63  ;;  %v1137_v4 = vmul.f32 0.5, %v1089_v61  ;;  %v1092_v5 = vadd.f32 %v2500_v2, %v3223_v52  ;;  %v1083_v6 = vpop.f32.mrb[27].mxu1  ;;  %v1223_v11 = vadd.f32 0.5, %v1191_v60 }
 0x212   : > { %v1226_v8 = vadd.f32 0.5, %v1194_v0  ;;  %v1135_v9 = vmul.f32 0.5, %v1081_v1  ;;  %v1084_v10 = vadd.f32 %v3223_v52, %v1083_v6 }
 0x213   : > { %v1224_v12 = vadd.f32 0.5, %v1192_v3  ;;  %2775 = vtanh.f32 %v1137_v4  ;;  %v1138_v13 = vmul.f32 0.5, %v1092_v5 }
 0x214   : > { %v1248_v14 = vpack.c.bf16 %v1226_v8, %v1225_v7  ;;  %2777 = vtanh.f32 %v1135_v9  ;;  %v1136_v15 = vmul.f32 0.5, %v1084_v10  ;;  %v3276_v7 = vld [vmem:[%s3513_s6] ss:$0 sm:$0xff] }
 0x215   : > { %v2768_v16 = vpop.eup %2767  ;;  %v1247_v17 = vpack.c.bf16 %v1224_v12, %v1223_v11  ;;  %2779 = vtanh.f32 %v1138_v13 }
 0x216   : > { %v2770_v18 = vpop.eup %2769  ;;  %v1197_v19 = vmul.f32 0.5, %v2768_v16  ;;  %2781 = vtanh.f32 %v1136_v15  ;;  %v2503_v20 = vpop.f32.mrb[28].mxu1 }
 0x217   : > { %v2772_v21 = vpop.eup %2771  ;;  %v1195_v22 = vmul.f32 0.5, %v2770_v18  ;;  %2529 = vmatprep.mubr.msk.bf16.mxu0 %vm1294_vm1, %v1247_v17  ;;  %v1105_v23 = vadd.f32 %v2503_v20, %v3223_v52  ;;  %v1096_v24 = vpop.f32.mrb[29].mxu1 }
 0x218   : > { %v2774_v25 = vpop.eup %2773  ;;  %v1229_v26 = vadd.f32 0.5, %v1197_v19  ;;  %v1198_v27 = vmul.f32 0.5, %v2772_v21  ;;  %2530 = vmatmul.mubr.msk.bf16.gmra.mrb[48].mxu0 %vm1294_vm1, %v1248_v14  ;;  %v1097_v28 = vadd.f32 %v3223_v52, %v1096_v24  ;;  %v2504_v30 = vpop.f32.mrb[30].mxu1 }
 0x219   : > { %v1227_v29 = vadd.f32 0.5, %v1195_v22  ;;  %v1196_v31 = vmul.f32 0.5, %v2774_v25  ;;  %v1141_v32 = vmul.f32 0.5, %v1105_v23  ;;  %v1108_v33 = vadd.f32 %v2504_v30, %v3223_v52  ;;  %v1099_v34 = vpop.f32.mrb[31].mxu1 }
 0x21a   : > { %v1230_v35 = vadd.f32 0.5, %v1198_v27  ;;  %v1139_v36 = vmul.f32 0.5, %v1097_v28  ;;  %v1100_v37 = vadd.f32 %v3223_v52, %v1099_v34 }
 0x21b   : > { %v1228_v38 = vadd.f32 0.5, %v1196_v31  ;;  %2783 = vtanh.f32 %v1141_v32  ;;  %v1142_v39 = vmul.f32 0.5, %v1108_v33 }
 0x21c   : > { %v1250_v40 = vpack.c.bf16 %v1230_v35, %v1229_v26  ;;  %2785 = vtanh.f32 %v1139_v36  ;;  %v1140_v41 = vmul.f32 0.5, %v1100_v37 }
 0x21d   : > { %v2776_v42 = vpop.eup %2775  ;;  %v1249_v43 = vpack.c.bf16 %v1228_v38, %v1227_v29  ;;  %2787 = vtanh.f32 %v1142_v39 }
 0x21e   : > { %v2778_v44 = vpop.eup %2777  ;;  %v1201_v45 = vmul.f32 0.5, %v2776_v42  ;;  %2789 = vtanh.f32 %v1140_v41 }
 0x21f   : > { %v2780_v46 = vpop.eup %2779  ;;  %v1199_v47 = vmul.f32 0.5, %v2778_v44  ;;  %2533 = vmatprep.mubr.msk.bf16.mxu0 %vm1294_vm1, %v1249_v43 }
 0x220   : > { %v2782_v48 = vpop.eup %2781  ;;  %v1233_v49 = vadd.f32 0.5, %v1201_v45  ;;  %v1202_v50 = vmul.f32 0.5, %v2780_v46  ;;  %2534 = vmatmul.mubr.msk.bf16.gmra.mrb[52].mxu0 %vm1294_vm1, %v1250_v40 }
 0x221   : > { %v1231_v52 = vadd.f32 0.5, %v1199_v47  ;;  %v1200_v51 = vmul.f32 0.5, %v2782_v48 }
 0x222   : > { %v1234_v53 = vadd.f32 0.5, %v1202_v50 }
 0x223   : > { %v1232_v54 = vadd.f32 0.5, %v1200_v51 }
 0x224   : > { %v1252_v55 = vpack.c.bf16 %v1234_v53, %v1233_v49 }
 0x225   : > { %v2784_v56 = vpop.eup %2783  ;;  %v1251_v57 = vpack.c.bf16 %v1232_v54, %v1231_v52 }
 0x226   : > { %v2786_v58 = vpop.eup %2785  ;;  %v1205_v59 = vmul.f32 0.5, %v2784_v56 }
 0x227   : > { %v2788_v60 = vpop.eup %2787  ;;  %v1203_v61 = vmul.f32 0.5, %v2786_v58  ;;  %2537 = vmatprep.mubr.msk.bf16.mxu0 %vm1294_vm1, %v1251_v57 }
 0x228   : > { %v2790_v62 = vpop.eup %2789  ;;  %v1237_v63 = vadd.f32 0.5, %v1205_v59  ;;  %v1206_v0 = vmul.f32 0.5, %v2788_v60  ;;  %2538 = vmatmul.mubr.msk.bf16.gmra.mrb[56].mxu0 %vm1294_vm1, %v1252_v55 }
 0x229   : > { %v1235_v1 = vadd.f32 0.5, %v1203_v61  ;;  %v1204_v2 = vmul.f32 0.5, %v2790_v62 }
 0x22a   : > { %v1238_v3 = vadd.f32 0.5, %v1206_v0 }
 0x22b   : > { %v1236_v4 = vadd.f32 0.5, %v1204_v2 }
 0x22c   : > { %v1254_v5 = vpack.c.bf16 %v1238_v3, %v1237_v63 }
 0x22d   : > { %v1253_v6 = vpack.c.bf16 %v1236_v4, %v1235_v1 }
 0x22f   : > { %2541 = vmatprep.mubr.msk.bf16.mxu0 %vm1294_vm1, %v1253_v6 }
 0x230   : > { %2542 = vmatmul.mubr.msk.bf16.gmra.mrb[60].mxu0 %vm1294_vm1, %v1254_v5 }
 0x2cb   : > { %v2515_v8 = vpop.f32.mrb[32].mxu0 }
 0x2cc   : > { %v1386_v9 = vadd.f32 %v2515_v8, %v3276_v7  ;;  %v1377_v10 = vpop.f32.mrb[33].mxu0 }
 0x2cd   : > { %v1378_v11 = vadd.f32 %v3276_v7, %v1377_v10  ;;  %v2516_v12 = vpop.f32.mrb[34].mxu0 }
 0x2ce   : > { %v1506_v13 = vmul.f32 0.5, %v1386_v9  ;;  %v1389_v14 = vadd.f32 %v2516_v12, %v3276_v7  ;;  %v1380_v15 = vpop.f32.mrb[35].mxu0 }
 0x2cf   : > { %v1504_v16 = vmul.f32 0.5, %v1378_v11  ;;  %v1381_v17 = vadd.f32 %v3276_v7, %v1380_v15 }
 0x2d0   : > { %2791 = vtanh.f32 %v1506_v13  ;;  %v1507_v18 = vmul.f32 0.5, %v1389_v14 }
 0x2d1   : > { %2793 = vtanh.f32 %v1504_v16  ;;  %v1505_v19 = vmul.f32 0.5, %v1381_v17 }
 0x2d2   : > { %2795 = vtanh.f32 %v1507_v18 }
 0x2d3   : > { %2797 = vtanh.f32 %v1505_v19  ;;  %v2519_v20 = vpop.f32.mrb[36].mxu0 }
 0x2d4   : > { %v1402_v21 = vadd.f32 %v2519_v20, %v3276_v7  ;;  %v1393_v22 = vpop.f32.mrb[37].mxu0 }
 0x2d5   : > { %v1394_v23 = vadd.f32 %v3276_v7, %v1393_v22  ;;  %v2520_v24 = vpop.f32.mrb[38].mxu0 }
 0x2d6   : > { %v1510_v25 = vmul.f32 0.5, %v1402_v21  ;;  %v1405_v26 = vadd.f32 %v2520_v24, %v3276_v7  ;;  %v1396_v27 = vpop.f32.mrb[39].mxu0 }
 0x2d7   : > { %v1508_v28 = vmul.f32 0.5, %v1394_v23  ;;  %v1397_v30 = vadd.f32 %v3276_v7, %v1396_v27 }
 0x2d8   : > { %2799 = vtanh.f32 %v1510_v25  ;;  %v1511_v29 = vmul.f32 0.5, %v1405_v26 }
 0x2d9   : > { %2801 = vtanh.f32 %v1508_v28  ;;  %v1509_v31 = vmul.f32 0.5, %v1397_v30 }
 0x2da   : > { %v2792_v32 = vpop.eup %2791  ;;  %2803 = vtanh.f32 %v1511_v29 }
 0x2db   : > { %v2794_v33 = vpop.eup %2793  ;;  %v1570_v34 = vmul.f32 0.5, %v2792_v32  ;;  %2805 = vtanh.f32 %v1509_v31  ;;  %v2523_v35 = vpop.f32.mrb[40].mxu0 }
 0x2dc   : > { %v2796_v36 = vpop.eup %2795  ;;  %v1568_v37 = vmul.f32 0.5, %v2794_v33  ;;  %v1418_v38 = vadd.f32 %v2523_v35, %v3276_v7  ;;  %v1409_v39 = vpop.f32.mrb[41].mxu0 }
 0x2dd   : > { %v2798_v40 = vpop.eup %2797  ;;  %v1571_v41 = vmul.f32 0.5, %v2796_v36  ;;  %v1410_v42 = vadd.f32 %v3276_v7, %v1409_v39  ;;  %v2524_v43 = vpop.f32.mrb[42].mxu0  ;;  %v1602_v48 = vadd.f32 0.5, %v1570_v34 }
 0x2de   : > { %v1569_v44 = vmul.f32 0.5, %v2798_v40  ;;  %v1514_v45 = vmul.f32 0.5, %v1418_v38  ;;  %v1421_v46 = vadd.f32 %v2524_v43, %v3276_v7  ;;  %v1412_v47 = vpop.f32.mrb[43].mxu0  ;;  %v1600_v51 = vadd.f32 0.5, %v1568_v37 }
 0x2df   : > { %v1603_v49 = vadd.f32 0.5, %v1571_v41  ;;  %v1512_v50 = vmul.f32 0.5, %v1410_v42  ;;  %v1413_v52 = vadd.f32 %v3276_v7, %v1412_v47 }
 0x2e0   : > { %v1601_v53 = vadd.f32 0.5, %v1569_v44  ;;  %2807 = vtanh.f32 %v1514_v45  ;;  %v1515_v54 = vmul.f32 0.5, %v1421_v46 }
 0x2e1   : > { %v1633_v55 = vpack.c.bf16 %v1603_v49, %v1602_v48  ;;  %2809 = vtanh.f32 %v1512_v50  ;;  %v1513_v56 = vmul.f32 0.5, %v1413_v52 }
 0x2e2   : > { %v2800_v57 = vpop.eup %2799  ;;  %v1632_v58 = vpack.c.bf16 %v1601_v53, %v1600_v51  ;;  %2811 = vtanh.f32 %v1515_v54 }
 0x2e3   : > { %v2802_v59 = vpop.eup %2801  ;;  %v1574_v60 = vmul.f32 0.5, %v2800_v57  ;;  %2813 = vtanh.f32 %v1513_v56  ;;  %v2527_v61 = vpop.f32.mrb[44].mxu0 }
 0x2e4   : > { %v2804_v62 = vpop.eup %2803  ;;  %v1572_v63 = vmul.f32 0.5, %v2802_v59  ;;  %v1434_v0 = vadd.f32 %v2527_v61, %v3276_v7  ;;  %v1425_v1 = vpop.f32.mrb[45].mxu0  ;;  %2549 = vmatprep.mubr.msk.bf16.mxu1 %vm525_vm0, %v1632_v58 }
 0x2e5   : > { %v2806_v2 = vpop.eup %2805  ;;  %v1575_v3 = vmul.f32 0.5, %v2804_v62  ;;  %v1426_v4 = vadd.f32 %v3276_v7, %v1425_v1  ;;  %v2528_v5 = vpop.f32.mrb[46].mxu0  ;;  %2550 = vmatmul.mubr.msk.bf16.vlgmr.msra.gmra.mrb[32].mxu1 %vm525_vm0, %v1633_v55  ;;  %v1606_v11 = vadd.f32 0.5, %v1574_v60 }
 0x2e6   : > { %v1573_v6 = vmul.f32 0.5, %v2806_v2  ;;  %v1518_v8 = vmul.f32 0.5, %v1434_v0  ;;  %v1437_v9 = vadd.f32 %v2528_v5, %v3276_v7  ;;  %v1428_v10 = vpop.f32.mrb[47].mxu0  ;;  %v1604_v15 = vadd.f32 0.5, %v1572_v63 }
 0x2e7   : > { %v1607_v12 = vadd.f32 0.5, %v1575_v3  ;;  %v1516_v13 = vmul.f32 0.5, %v1426_v4  ;;  %v1429_v14 = vadd.f32 %v3276_v7, %v1428_v10 }
 0x2e8   : > { %v1605_v16 = vadd.f32 0.5, %v1573_v6  ;;  %2815 = vtanh.f32 %v1518_v8  ;;  %v1519_v17 = vmul.f32 0.5, %v1437_v9 }
 0x2e9   : > { %v1635_v18 = vpack.c.bf16 %v1607_v12, %v1606_v11  ;;  %2817 = vtanh.f32 %v1516_v13  ;;  %v1517_v19 = vmul.f32 0.5, %v1429_v14 }
 0x2ea   : > { %v2808_v20 = vpop.eup %2807  ;;  %v1634_v21 = vpack.c.bf16 %v1605_v16, %v1604_v15  ;;  %2819 = vtanh.f32 %v1519_v17 }
 0x2eb   : > { %v2810_v22 = vpop.eup %2809  ;;  %v1578_v23 = vmul.f32 0.5, %v2808_v20  ;;  %2821 = vtanh.f32 %v1517_v19  ;;  %v2531_v24 = vpop.f32.mrb[48].mxu0 }
 0x2ec   : > { %v2812_v25 = vpop.eup %2811  ;;  %v1576_v26 = vmul.f32 0.5, %v2810_v22  ;;  %v1450_v27 = vadd.f32 %v2531_v24, %v3276_v7  ;;  %v1441_v28 = vpop.f32.mrb[49].mxu0  ;;  %2553 = vmatprep.mubr.msk.bf16.mxu1 %vm525_vm0, %v1634_v21 }
 0x2ed   : > { %v2814_v30 = vpop.eup %2813  ;;  %v1579_v29 = vmul.f32 0.5, %v2812_v25  ;;  %v1442_v31 = vadd.f32 %v3276_v7, %v1441_v28  ;;  %v2532_v32 = vpop.f32.mrb[50].mxu0  ;;  %2554 = vmatmul.mubr.msk.bf16.gmra.mrb[36].mxu1 %vm525_vm0, %v1635_v18  ;;  %v1610_v37 = vadd.f32 0.5, %v1578_v23 }
 0x2ee   : > { %v1577_v33 = vmul.f32 0.5, %v2814_v30  ;;  %v1522_v34 = vmul.f32 0.5, %v1450_v27  ;;  %v1453_v35 = vadd.f32 %v2532_v32, %v3276_v7  ;;  %v1444_v36 = vpop.f32.mrb[51].mxu0  ;;  %v1608_v41 = vadd.f32 0.5, %v1576_v26 }
 0x2ef   : > { %v1611_v38 = vadd.f32 0.5, %v1579_v29  ;;  %v1520_v39 = vmul.f32 0.5, %v1442_v31  ;;  %v1445_v40 = vadd.f32 %v3276_v7, %v1444_v36 }
 0x2f0   : > { %v1609_v42 = vadd.f32 0.5, %v1577_v33  ;;  %2823 = vtanh.f32 %v1522_v34  ;;  %v1523_v43 = vmul.f32 0.5, %v1453_v35 }
 0x2f1   : > { %v1637_v44 = vpack.c.bf16 %v1611_v38, %v1610_v37  ;;  %2825 = vtanh.f32 %v1520_v39  ;;  %v1521_v45 = vmul.f32 0.5, %v1445_v40 }
 0x2f2   : > { %v2816_v46 = vpop.eup %2815  ;;  %v1636_v47 = vpack.c.bf16 %v1609_v42, %v1608_v41  ;;  %2827 = vtanh.f32 %v1523_v43 }
 0x2f3   : > { %v2818_v48 = vpop.eup %2817  ;;  %v1582_v49 = vmul.f32 0.5, %v2816_v46  ;;  %2829 = vtanh.f32 %v1521_v45  ;;  %v2535_v50 = vpop.f32.mrb[52].mxu0 }
 0x2f4   : > { %v2820_v52 = vpop.eup %2819  ;;  %v1580_v51 = vmul.f32 0.5, %v2818_v48  ;;  %v1466_v53 = vadd.f32 %v2535_v50, %v3276_v7  ;;  %v1457_v54 = vpop.f32.mrb[53].mxu0  ;;  %2557 = vmatprep.mubr.msk.bf16.mxu1 %vm525_vm0, %v1636_v47 }
 0x2f5   : > { %v2822_v55 = vpop.eup %2821  ;;  %v1583_v56 = vmul.f32 0.5, %v2820_v52  ;;  %v1458_v57 = vadd.f32 %v3276_v7, %v1457_v54  ;;  %v2536_v58 = vpop.f32.mrb[54].mxu0  ;;  %2558 = vmatmul.mubr.msk.bf16.gmra.mrb[40].mxu1 %vm525_vm0, %v1637_v44  ;;  %v1614_v63 = vadd.f32 0.5, %v1582_v49 }
 0x2f6   : > { %v1581_v59 = vmul.f32 0.5, %v2822_v55  ;;  %v1526_v60 = vmul.f32 0.5, %v1466_v53  ;;  %v1469_v61 = vadd.f32 %v2536_v58, %v3276_v7  ;;  %v1460_v62 = vpop.f32.mrb[55].mxu0  ;;  %v1612_v3 = vadd.f32 0.5, %v1580_v51 }
 0x2f7   : > { %v1615_v0 = vadd.f32 0.5, %v1583_v56  ;;  %v1524_v1 = vmul.f32 0.5, %v1458_v57  ;;  %v1461_v2 = vadd.f32 %v3276_v7, %v1460_v62 }
 0x2f8   : > { %v1613_v4 = vadd.f32 0.5, %v1581_v59  ;;  %2831 = vtanh.f32 %v1526_v60  ;;  %v1527_v5 = vmul.f32 0.5, %v1469_v61 }
 0x2f9   : > { %v1639_v6 = vpack.c.bf16 %v1615_v0, %v1614_v63  ;;  %2833 = vtanh.f32 %v1524_v1  ;;  %v1525_v8 = vmul.f32 0.5, %v1461_v2 }
 0x2fa   : > { %v2824_v9 = vpop.eup %2823  ;;  %v1638_v10 = vpack.c.bf16 %v1613_v4, %v1612_v3  ;;  %2835 = vtanh.f32 %v1527_v5 }
 0x2fb   : > { %v2826_v11 = vpop.eup %2825  ;;  %v1586_v12 = vmul.f32 0.5, %v2824_v9  ;;  %2837 = vtanh.f32 %v1525_v8  ;;  %v2539_v13 = vpop.f32.mrb[56].mxu0 }
 0x2fc   : > { %v2828_v14 = vpop.eup %2827  ;;  %v1584_v15 = vmul.f32 0.5, %v2826_v11  ;;  %v1482_v16 = vadd.f32 %v2539_v13, %v3276_v7  ;;  %2561 = vmatprep.mubr.msk.bf16.mxu1 %vm525_vm0, %v1638_v10  ;;  %v1473_v17 = vpop.f32.mrb[57].mxu0 }
 0x2fd   : > { %v2830_v18 = vpop.eup %2829  ;;  %v1587_v19 = vmul.f32 0.5, %v2828_v14  ;;  %v1474_v20 = vadd.f32 %v3276_v7, %v1473_v17  ;;  %2562 = vmatmul.mubr.msk.bf16.gmra.mrb[44].mxu1 %vm525_vm0, %v1639_v6  ;;  %v2540_v21 = vpop.f32.mrb[58].mxu0  ;;  %v1618_v26 = vadd.f32 0.5, %v1586_v12 }
 0x2fe   : > { %v1585_v22 = vmul.f32 0.5, %v2830_v18  ;;  %v1530_v23 = vmul.f32 0.5, %v1482_v16  ;;  %v1485_v24 = vadd.f32 %v2540_v21, %v3276_v7  ;;  %v1476_v25 = vpop.f32.mrb[59].mxu0  ;;  %v1616_v29 = vadd.f32 0.5, %v1584_v15 }
 0x2ff   : > { %v1619_v27 = vadd.f32 0.5, %v1587_v19  ;;  %v1528_v28 = vmul.f32 0.5, %v1474_v20  ;;  %v1477_v30 = vadd.f32 %v3276_v7, %v1476_v25 }
 0x300   : > { %v1617_v31 = vadd.f32 0.5, %v1585_v22  ;;  %2839 = vtanh.f32 %v1530_v23  ;;  %v1531_v32 = vmul.f32 0.5, %v1485_v24 }
 0x301   : > { %v1641_v33 = vpack.c.bf16 %v1619_v27, %v1618_v26  ;;  %2841 = vtanh.f32 %v1528_v28  ;;  %v1529_v34 = vmul.f32 0.5, %v1477_v30  ;;  %v3329_v26 = vld [vmem:[%s3516_s9] sm:$0x1]  ;;  %v2983_v28 = vmov 0  }
 0x302   : > { %v2832_v35 = vpop.eup %2831  ;;  %v1640_v36 = vpack.c.bf16 %v1617_v31, %v1616_v29  ;;  %2843 = vtanh.f32 %v1531_v32  ;;  %2419 = vmatprep.mubr.msk.bf16.mxu0 %vm2035_vm2, %v3329_v26  ;;  %v2025_v27 = vld [vmem:[#allocation2] sm:$0x1]  ;;  %2630 = vset.pattern.permute.xlu0 %v2983_v28 }
 0x303   : > { %v2834_v37 = vpop.eup %2833  ;;  %v1590_v38 = vmul.f32 0.5, %v2832_v35  ;;  %2845 = vtanh.f32 %v1529_v34  ;;  %v2543_v39 = vpop.f32.mrb[60].mxu0  ;;  %2028 = vperm.xlu0 %2630, %v2025_v27   ;;  %v3336_v30 = vld [vmem:[%s3515_s8] ss:$0 sm:$0xff] }
 0x304   : > { %v2836_v40 = vpop.eup %2835  ;;  %v1588_v41 = vmul.f32 0.5, %v2834_v37  ;;  %2565 = vmatprep.mubr.msk.bf16.mxu1 %vm525_vm0, %v1640_v36  ;;  %v1498_v42 = vadd.f32 %v2543_v39, %v3276_v7  ;;  %v1489_v43 = vpop.f32.mrb[61].mxu0 }
 0x305   : > { %v2838_v44 = vpop.eup %2837  ;;  %v1591_v45 = vmul.f32 0.5, %v2836_v40  ;;  %2566 = vmatmul.mubr.msk.bf16.gmra.mrb[48].mxu1 %vm525_vm0, %v1641_v33  ;;  %v1490_v46 = vadd.f32 %v3276_v7, %v1489_v43  ;;  %v2544_v47 = vpop.f32.mrb[62].mxu0  ;;  %v1622_v51 = vadd.f32 0.5, %v1590_v38 }
 0x306   : > { %v1589_v48 = vmul.f32 0.5, %v2838_v44  ;;  %v1534_v49 = vmul.f32 0.5, %v1498_v42  ;;  %v1501_v50 = vadd.f32 %v2544_v47, %v3276_v7  ;;  %v1492_v52 = vpop.f32.mrb[63].mxu0  ;;  %v1620_v56 = vadd.f32 0.5, %v1588_v41 }
 0x307   : > { %v1623_v53 = vadd.f32 0.5, %v1591_v45  ;;  %v1532_v54 = vmul.f32 0.5, %v1490_v46  ;;  %v1493_v55 = vadd.f32 %v3276_v7, %v1492_v52 }
 0x308   : > { %v1621_v57 = vadd.f32 0.5, %v1589_v48  ;;  %2847 = vtanh.f32 %v1534_v49  ;;  %v1535_v58 = vmul.f32 0.5, %v1501_v50 }
 0x309   : > { %v1643_v59 = vpack.c.bf16 %v1623_v53, %v1622_v51  ;;  %2849 = vtanh.f32 %v1532_v54  ;;  %v1533_v60 = vmul.f32 0.5, %v1493_v55 }
 0x30a   : > { %v2840_v61 = vpop.eup %2839  ;;  %v1642_v62 = vpack.c.bf16 %v1621_v57, %v1620_v56  ;;  %2851 = vtanh.f32 %v1535_v58 }
 0x30b   : > { %v2842_v63 = vpop.eup %2841  ;;  %v1594_v0 = vmul.f32 0.5, %v2840_v61  ;;  %2853 = vtanh.f32 %v1533_v60 }
 0x30c   : > { %v2844_v1 = vpop.eup %2843  ;;  %v1592_v2 = vmul.f32 0.5, %v2842_v63  ;;  %2569 = vmatprep.mubr.msk.bf16.mxu1 %vm525_vm0, %v1642_v62 }
 0x30d   : > { %v2846_v3 = vpop.eup %2845  ;;  %v1626_v4 = vadd.f32 0.5, %v1594_v0  ;;  %v1595_v7 = vmul.f32 0.5, %v2844_v1  ;;  %2570 = vmatmul.mubr.msk.bf16.gmra.mrb[52].mxu1 %vm525_vm0, %v1643_v59 }
 0x30e   : > { %v1624_v5 = vadd.f32 0.5, %v1592_v2  ;;  %v1593_v6 = vmul.f32 0.5, %v2846_v3 }
 0x30f   : > { %v1627_v8 = vadd.f32 0.5, %v1595_v7 }
 0x310   : > { %v1625_v9 = vadd.f32 0.5, %v1593_v6 }
 0x311   : > { %v1645_v10 = vpack.c.bf16 %v1627_v8, %v1626_v4 }
 0x312   : > { %v2848_v11 = vpop.eup %2847  ;;  %v1644_v12 = vpack.c.bf16 %v1625_v9, %v1624_v5 }
 0x313   : > { %v2850_v13 = vpop.eup %2849  ;;  %v1598_v14 = vmul.f32 0.5, %v2848_v11 }
 0x314   : > { %v2852_v15 = vpop.eup %2851  ;;  %v1596_v16 = vmul.f32 0.5, %v2850_v13  ;;  %2573 = vmatprep.mubr.msk.bf16.mxu1 %vm525_vm0, %v1644_v12 }
 0x315   : > { %v2854_v17 = vpop.eup %2853  ;;  %v1630_v18 = vadd.f32 0.5, %v1598_v14  ;;  %v1599_v19 = vmul.f32 0.5, %v2852_v15  ;;  %2574 = vmatmul.mubr.msk.bf16.gmra.mrb[56].mxu1 %vm525_vm0, %v1645_v10 }
 0x316   : > { %v1628_v20 = vadd.f32 0.5, %v1596_v16  ;;  %v1597_v21 = vmul.f32 0.5, %v2854_v17 }
 0x317   : > { %v1631_v22 = vadd.f32 0.5, %v1599_v19 }
 0x318   : > { %v1629_v23 = vadd.f32 0.5, %v1597_v21 }
 0x319   : > { %v1647_v24 = vpack.c.bf16 %v1631_v22, %v1630_v18 }
 0x31a   : > { %v1646_v25 = vpack.c.bf16 %v1629_v23, %v1628_v20 }
 0x31c   : > { %2577 = vmatprep.mubr.msk.bf16.mxu1 %vm525_vm0, %v1646_v25 }
 0x31d   : > { %2578 = vmatmul.mubr.msk.bf16.gmra.mrb[60].mxu1 %vm525_vm0, %v1647_v24 }
 0x3b8   : > { %v2551_v29 = vpop.f32.mrb[32].mxu1 }
 0x3b9   : > { %v1762_v31 = vadd.f32 %v2551_v29, %v3336_v30  ;;  %v1753_v32 = vpop.f32.mrb[33].mxu1 }
 0x3ba   : > { %v1754_v33 = vadd.f32 %v3336_v30, %v1753_v32  ;;  %v2552_v34 = vpop.f32.mrb[34].mxu1 }
 0x3bb   : > { %v1882_v35 = vmul.f32 0.5, %v1762_v31  ;;  %v1765_v36 = vadd.f32 %v2552_v34, %v3336_v30  ;;  %v1756_v37 = vpop.f32.mrb[35].mxu1 }
 0x3bc   : > { %v1880_v38 = vmul.f32 0.5, %v1754_v33  ;;  %v1757_v39 = vadd.f32 %v3336_v30, %v1756_v37 }
 0x3bd   : > { %2855 = vtanh.f32 %v1882_v35  ;;  %v1883_v40 = vmul.f32 0.5, %v1765_v36 }
 0x3be   : > { %2857 = vtanh.f32 %v1880_v38  ;;  %v1881_v41 = vmul.f32 0.5, %v1757_v39 }
 0x3bf   : > { %2859 = vtanh.f32 %v1883_v40 }
 0x3c0   : > { %2861 = vtanh.f32 %v1881_v41  ;;  %v2555_v42 = vpop.f32.mrb[36].mxu1 }
 0x3c1   : > { %v1778_v43 = vadd.f32 %v2555_v42, %v3336_v30  ;;  %v1769_v44 = vpop.f32.mrb[37].mxu1 }
 0x3c2   : > { %v1770_v45 = vadd.f32 %v3336_v30, %v1769_v44  ;;  %v2556_v46 = vpop.f32.mrb[38].mxu1 }
 0x3c3   : > { %v1886_v47 = vmul.f32 0.5, %v1778_v43  ;;  %v1781_v48 = vadd.f32 %v2556_v46, %v3336_v30  ;;  %v1772_v49 = vpop.f32.mrb[39].mxu1 }
 0x3c4   : > { %v1884_v50 = vmul.f32 0.5, %v1770_v45  ;;  %v1773_v52 = vadd.f32 %v3336_v30, %v1772_v49 }
 0x3c5   : > { %2863 = vtanh.f32 %v1886_v47  ;;  %v1887_v51 = vmul.f32 0.5, %v1781_v48 }
 0x3c6   : > { %2865 = vtanh.f32 %v1884_v50  ;;  %v1885_v53 = vmul.f32 0.5, %v1773_v52 }
 0x3c7   : > { %v2856_v54 = vpop.eup %2855  ;;  %2867 = vtanh.f32 %v1887_v51 }
 0x3c8   : > { %v2858_v55 = vpop.eup %2857  ;;  %v1946_v56 = vmul.f32 0.5, %v2856_v54  ;;  %2869 = vtanh.f32 %v1885_v53  ;;  %v2559_v57 = vpop.f32.mrb[40].mxu1 }
 0x3c9   : > { %v2860_v58 = vpop.eup %2859  ;;  %v1944_v59 = vmul.f32 0.5, %v2858_v55  ;;  %v1794_v60 = vadd.f32 %v2559_v57, %v3336_v30  ;;  %v1785_v61 = vpop.f32.mrb[41].mxu1 }
 0x3ca   : > { %v2862_v62 = vpop.eup %2861  ;;  %v1947_v63 = vmul.f32 0.5, %v2860_v58  ;;  %v1786_v0 = vadd.f32 %v3336_v30, %v1785_v61  ;;  %v2560_v1 = vpop.f32.mrb[42].mxu1  ;;  %v3349_v5 = vadd.f32 0.5, %v1946_v56 }
 0x3cb   : > { %v1945_v2 = vmul.f32 0.5, %v2862_v62  ;;  %v1890_v3 = vmul.f32 0.5, %v1794_v60  ;;  %v1797_v4 = vadd.f32 %v2560_v1, %v3336_v30  ;;  %v1788_v7 = vpop.f32.mrb[43].mxu1  ;;  %v3354_v10 = vadd.f32 0.5, %v1944_v59 }
 0x3cc   : > { %v3351_v6 = vadd.f32 0.5, %v1947_v63  ;;  %v1888_v8 = vmul.f32 0.5, %v1786_v0  ;;  %v1789_v9 = vadd.f32 %v3336_v30, %v1788_v7 }
 0x3cd   : > { %v3356_v11 = vadd.f32 0.5, %v1945_v2  ;;  %2871 = vtanh.f32 %v1890_v3  ;;  %v1891_v12 = vmul.f32 0.5, %v1797_v4 }
 0x3ce   : > { %2873 = vtanh.f32 %v1888_v8  ;;  %v1889_v13 = vmul.f32 0.5, %v1789_v9  ;;  %v2009_v14 = vpack.c.bf16 %v3351_v6, %v3349_v5 }
 0x3cf   : > { %v2864_v15 = vpop.eup %2863  ;;  %2875 = vtanh.f32 %v1891_v12  ;;  %v2008_v16 = vpack.c.bf16 %v3356_v11, %v3354_v10 }
 0x3d0   : > { %v2866_v17 = vpop.eup %2865  ;;  %v1950_v18 = vmul.f32 0.5, %v2864_v15  ;;  %2877 = vtanh.f32 %v1889_v13  ;;  %v2563_v19 = vpop.f32.mrb[44].mxu1 }
 0x3d1   : > { %v2868_v20 = vpop.eup %2867  ;;  %v1948_v21 = vmul.f32 0.5, %v2866_v17  ;;  %v1810_v22 = vadd.f32 %v2563_v19, %v3336_v30  ;;  %v1801_v23 = vpop.f32.mrb[45].mxu1 }
 0x3d2   : > { %v2870_v24 = vpop.eup %2869  ;;  %v1951_v25 = vmul.f32 0.5, %v2868_v20  ;;  %v1802_v27 = vadd.f32 %v3336_v30, %v1801_v23  ;;  %v2564_v28 = vpop.f32.mrb[46].mxu1  ;;  %v3365_v34 = vadd.f32 0.5, %v1950_v18 }
 0x3d3   : > { %v1949_v29 = vmul.f32 0.5, %v2870_v24  ;;  %v1894_v31 = vmul.f32 0.5, %v1810_v22  ;;  %v1813_v32 = vadd.f32 %v2564_v28, %v3336_v30  ;;  %v1804_v33 = vpop.f32.mrb[47].mxu1  ;;  %v3370_v38 = vadd.f32 0.5, %v1948_v21 }
 0x3d4   : > { %v3367_v35 = vadd.f32 0.5, %v1951_v25  ;;  %v1892_v36 = vmul.f32 0.5, %v1802_v27  ;;  %v1805_v37 = vadd.f32 %v3336_v30, %v1804_v33 }
 0x3d5   : > { %v3372_v39 = vadd.f32 0.5, %v1949_v29  ;;  %2879 = vtanh.f32 %v1894_v31  ;;  %v1895_v40 = vmul.f32 0.5, %v1813_v32 }
 0x3d6   : > { %2881 = vtanh.f32 %v1892_v36  ;;  %v1893_v41 = vmul.f32 0.5, %v1805_v37  ;;  %v2011_v42 = vpack.c.bf16 %v3367_v35, %v3365_v34 }
 0x3d7   : > { %v2872_v43 = vpop.eup %2871  ;;  %2883 = vtanh.f32 %v1895_v40  ;;  %v2010_v44 = vpack.c.bf16 %v3372_v39, %v3370_v38 }
 0x3d8   : > { %v2874_v45 = vpop.eup %2873  ;;  %v1954_v46 = vmul.f32 0.5, %v2872_v43  ;;  %2885 = vtanh.f32 %v1893_v41  ;;  %v2567_v47 = vpop.f32.mrb[48].mxu1 }
 0x3d9   : > { %v2876_v48 = vpop.eup %2875  ;;  %v1952_v49 = vmul.f32 0.5, %v2874_v45  ;;  %v1826_v50 = vadd.f32 %v2567_v47, %v3336_v30  ;;  %v1817_v52 = vpop.f32.mrb[49].mxu1  ;;  %v2046_v5 = vsel %vm2035_vm2, %v2010_v44, 0 }
 0x3da   : > { %v2878_v51 = vpop.eup %2877  ;;  %v1955_v53 = vmul.f32 0.5, %v2876_v48  ;;  %v1818_v54 = vadd.f32 %v3336_v30, %v1817_v52  ;;  %v2568_v55 = vpop.f32.mrb[50].mxu1  ;;  %v3381_v60 = vadd.f32 0.5, %v1954_v46 }
 0x3db   : > { %v1953_v56 = vmul.f32 0.5, %v2878_v51  ;;  %v1898_v57 = vmul.f32 0.5, %v1826_v50  ;;  %v1829_v58 = vadd.f32 %v2568_v55, %v3336_v30  ;;  %v1820_v59 = vpop.f32.mrb[51].mxu1  ;;  %v3386_v0 = vadd.f32 0.5, %v1952_v49 }
 0x3dc   : > { %v3383_v61 = vadd.f32 0.5, %v1955_v53  ;;  %v1896_v62 = vmul.f32 0.5, %v1818_v54  ;;  %v1821_v63 = vadd.f32 %v3336_v30, %v1820_v59 }
 0x3dd   : > { %v3388_v1 = vadd.f32 0.5, %v1953_v56  ;;  %2887 = vtanh.f32 %v1898_v57  ;;  %v1899_v2 = vmul.f32 0.5, %v1829_v58 }
 0x3de   : > { %2889 = vtanh.f32 %v1896_v62  ;;  %v1897_v3 = vmul.f32 0.5, %v1821_v63  ;;  %v2013_v4 = vpack.c.bf16 %v3383_v61, %v3381_v60  ;;  %v2029_v61 = vpop.permute.xlu0 %2028 }
 0x3df   : > { %v2880_v7 = vpop.eup %2879  ;;  %2891 = vtanh.f32 %v1899_v2  ;;  %v2012_v8 = vpack.c.bf16 %v3388_v1, %v3386_v0  ;;  %v2984_v0 = vmov 1966171168  }
 0x3e0   : > { %v2882_v9 = vpop.eup %2881  ;;  %v1958_v12 = vmul.f32 0.5, %v2880_v7  ;;  %2893 = vtanh.f32 %v1897_v3  ;;  %v2571_v13 = vpop.f32.mrb[52].mxu1  ;;  %v2055_v39 = vsel %vm2035_vm2, %v2013_v4, 0  ;;  %v2132_v1 = vunpack.c.l.s4 %v2984_v0 }
 0x3e1   : > { %v2884_v15 = vpop.eup %2883  ;;  %v1956_v17 = vmul.f32 0.5, %v2882_v9  ;;  %v1842_v18 = vadd.f32 %v2571_v13, %v3336_v30  ;;  %v1833_v19 = vpop.f32.mrb[53].mxu1  ;;  %v2052_v38 = vsel %vm2035_vm2, %v2012_v8, 0 }
 0x3e2   : > { %v2886_v20 = vpop.eup %2885  ;;  %v1959_v21 = vmul.f32 0.5, %v2884_v15  ;;  %v1834_v22 = vadd.f32 %v3336_v30, %v1833_v19  ;;  %v2572_v23 = vpop.f32.mrb[54].mxu1  ;;  %v3397_v29 = vadd.f32 0.5, %v1958_v12  ;;  %v2133_v8 = vunpack.c.0.s8 %v2132_v1 }
 0x3e3   : > { %v1957_v24 = vmul.f32 0.5, %v2886_v20  ;;  %v1902_v25 = vmul.f32 0.5, %v1842_v18  ;;  %v1845_v27 = vadd.f32 %v2572_v23, %v3336_v30  ;;  %v1836_v28 = vpop.f32.mrb[55].mxu1  ;;  %v3402_v36 = vadd.f32 0.5, %v1956_v17 }
 0x3e4   : > { %v3399_v31 = vadd.f32 0.5, %v1959_v21  ;;  %v1900_v32 = vmul.f32 0.5, %v1834_v22  ;;  %v1837_v33 = vadd.f32 %v3336_v30, %v1836_v28 }
 0x3e5   : > { %v3404_v37 = vadd.f32 0.5, %v1957_v24  ;;  %2895 = vtanh.f32 %v1902_v25  ;;  %v1903_v40 = vmul.f32 0.5, %v1845_v27  ;;  %v2040_v27 = vsel %vm2035_vm2, %v2008_v16, 0 }
 0x3e6   : > { %2897 = vtanh.f32 %v1900_v32  ;;  %v1901_v41 = vmul.f32 0.5, %v1837_v33  ;;  %v2015_v43 = vpack.c.bf16 %v3399_v31, %v3397_v29 }
 0x3e7   : > { %v2888_v45 = vpop.eup %2887  ;;  %2899 = vtanh.f32 %v1903_v40  ;;  %v2014_v46 = vpack.c.bf16 %v3404_v37, %v3402_v36 }
 0x3e8   : > { %v2890_v47 = vpop.eup %2889  ;;  %v1962_v48 = vmul.f32 0.5, %v2888_v45  ;;  %2901 = vtanh.f32 %v1901_v41  ;;  %v2575_v49 = vpop.f32.mrb[56].mxu1  ;;  %v2061_v35 = vsel %vm2035_vm2, %v2015_v43, 0 }
 0x3e9   : > { %v2892_v50 = vpop.eup %2891  ;;  %v1960_v52 = vmul.f32 0.5, %v2890_v47  ;;  %v1858_v51 = vadd.f32 %v2575_v49, %v3336_v30  ;;  %v1849_v53 = vpop.f32.mrb[57].mxu1  ;;  %v2058_v34 = vsel %vm2035_vm2, %v2014_v46, 0 }
 0x3ea   : > { %v2894_v54 = vpop.eup %2893  ;;  %v1963_v55 = vmul.f32 0.5, %v2892_v50  ;;  %v1850_v56 = vadd.f32 %v3336_v30, %v1849_v53  ;;  %v2576_v57 = vpop.f32.mrb[58].mxu1  ;;  %v1994_v2 = vadd.f32 0.5, %v1962_v48 }
 0x3eb   : > { %v1961_v58 = vmul.f32 0.5, %v2894_v54  ;;  %v1906_v59 = vmul.f32 0.5, %v1858_v51  ;;  %v1861_v62 = vadd.f32 %v2576_v57, %v3336_v30  ;;  %v1852_v63 = vpop.f32.mrb[59].mxu1  ;;  %v1992_v12 = vadd.f32 0.5, %v1960_v52 }
 0x3ec   : > { %v1995_v3 = vadd.f32 0.5, %v1963_v55  ;;  %v1904_v7 = vmul.f32 0.5, %v1850_v56  ;;  %v1853_v9 = vadd.f32 %v3336_v30, %v1852_v63 }
 0x3ed   : > { %v1993_v13 = vadd.f32 0.5, %v1961_v58  ;;  %2903 = vtanh.f32 %v1906_v59  ;;  %v1907_v15 = vmul.f32 0.5, %v1861_v62 }
 0x3ee   : > { %v2017_v17 = vpack.c.bf16 %v1995_v3, %v1994_v2  ;;  %2905 = vtanh.f32 %v1904_v7  ;;  %v1905_v18 = vmul.f32 0.5, %v1853_v9 }
 0x3ef   : > { %v2896_v19 = vpop.eup %2895  ;;  %v2016_v20 = vpack.c.bf16 %v1993_v13, %v1992_v12  ;;  %2907 = vtanh.f32 %v1907_v15 }
 0x3f0   : > { %v2898_v21 = vpop.eup %2897  ;;  %v1966_v22 = vmul.f32 0.5, %v2896_v19  ;;  %2909 = vtanh.f32 %v1905_v18  ;;  %v2579_v23 = vpop.f32.mrb[60].mxu1 }
 0x3f1   : > { %v2900_v24 = vpop.eup %2899  ;;  %v1964_v25 = vmul.f32 0.5, %v2898_v21  ;;  %2581 = vmatprep.subr.msk.bf16.mxu0 %vm2035_vm2, %v2016_v20  ;;  %v1874_v28 = vadd.f32 %v2579_v23, %v3336_v30  ;;  %v1865_v32 = vpop.f32.mrb[61].mxu1 }
 0x3f2   : > { %v2902_v33 = vpop.eup %2901  ;;  %v1967_v40 = vmul.f32 0.5, %v2900_v24  ;;  %2404 = vmatpush3.bf16.xpose.msra.mxu0 %v2040_v27  ;;  %v1866_v41 = vadd.f32 %v3336_v30, %v1865_v32  ;;  %v2580_v45 = vpop.f32.mrb[62].mxu1  ;;  %v1998_v52 = vadd.f32 0.5, %v1966_v22 }
 0x3f3   : > { %v1965_v47 = vmul.f32 0.5, %v2902_v33  ;;  %2582 = vmatprep.subr.msk.bf16.mxu0 %vm2035_vm2, %v2017_v17  ;;  %v1910_v48 = vmul.f32 0.5, %v1874_v28  ;;  %v1877_v49 = vadd.f32 %v2580_v45, %v3336_v30  ;;  %v1868_v50 = vpop.f32.mrb[63].mxu1  ;;  %v1996_v51 = vadd.f32 0.5, %v1964_v25 }
 0x3f4   : > { %v1999_v10 = vadd.f32 0.5, %v1967_v40  ;;  %v1908_v11 = vmul.f32 0.5, %v1866_v41  ;;  %v1869_v16 = vadd.f32 %v3336_v30, %v1868_v50  ;;  %v2043_v30 = vsel %vm2035_vm2, %v2009_v14, 0 }
 0x3f5   : > { %v1997_v53 = vadd.f32 0.5, %v1965_v47  ;;  %2911 = vtanh.f32 %v1910_v48  ;;  %v1911_v54 = vmul.f32 0.5, %v1877_v49  ;;  %v2049_v45 = vsel %vm2035_vm2, %v2011_v42, 0 }
 0x3f6   : > { %v2019_v55 = vpack.c.bf16 %v1999_v10, %v1998_v52  ;;  %2913 = vtanh.f32 %v1908_v11  ;;  %v1909_v56 = vmul.f32 0.5, %v1869_v16  ;;  %v2031_v42 = vlaneseq }
 0x3f7   : > { %v2904_v57 = vpop.eup %2903  ;;  %v2018_v58 = vpack.c.bf16 %v1997_v53, %v1996_v51  ;;  %2915 = vtanh.f32 %v1911_v54 }
 0x3f8   : > { %v2906_v59 = vpop.eup %2905  ;;  %v1970_v62 = vmul.f32 0.5, %v2904_v57  ;;  %2917 = vtanh.f32 %v1909_v56  ;;  %v2032_v44 = vshrl.u32 %v2031_v42, 7  ;;  %vm2148_vm3 = vcmp.lt.s32.totalorder %v2031_v42, 256 }
 0x3f9   : > { %v2908_v63 = vpop.eup %2907  ;;  %v1968_v2 = vmul.f32 0.5, %v2906_v59 }
 0x3fa   : > { %v2910_v3 = vpop.eup %2909  ;;  %v2002_v7 = vadd.f32 0.5, %v1970_v62  ;;  %v1971_v9 = vmul.f32 0.5, %v2908_v63  ;;  %2406 = vmatpush3.bf16.xpose.msra.mxu0 %v2043_v30  ;;  %v2033_v60 = vsub.s32 0, %v2032_v44  ;;  %v2136_v43 = vsub.s32 %v2133_v8, %v2032_v44 }
 0x3fb   : > { %v2000_v12 = vadd.f32 0.5, %v1968_v2  ;;  %v1969_v13 = vmul.f32 0.5, %v2910_v3  ;;  %2583 = vmatprep.subr.msk.bf16.mxu0 %vm2035_vm2, %v2018_v58 }
 0x3fc   : > { %v2003_v15 = vadd.f32 0.5, %v1971_v9  ;;  %v2034_v4 = vrot.slane %v2029_v61, %v2033_v60 }
 0x3fd   : > { %v2001_v17 = vadd.f32 0.5, %v1969_v13 }
 0x3fe   : > { %v2021_v18 = vpack.c.bf16 %v2003_v15, %v2002_v7 }
 0x3ff   : > { %v2912_v19 = vpop.eup %2911  ;;  %v2020_v20 = vpack.c.bf16 %v2001_v17, %v2000_v12 }
 0x400   : > { %v2914_v21 = vpop.eup %2913  ;;  %v1974_v22 = vmul.f32 0.5, %v2912_v19 }
 0x401   : > { %v2916_v23 = vpop.eup %2915  ;;  %v1972_v24 = vmul.f32 0.5, %v2914_v21 }
 0x402   : > { %v2918_v6 = vpop.eup %2917  ;;  %v2006_v14 = vadd.f32 0.5, %v1974_v22  ;;  %v1975_v25 = vmul.f32 0.5, %v2916_v23  ;;  %2408 = vmatpush3.bf16.xpose.msra.mxu0 %v2046_v5 }
 0x403   : > { %v2004_v27 = vadd.f32 0.5, %v1972_v24  ;;  %v1973_v28 = vmul.f32 0.5, %v2918_v6  ;;  %2584 = vmatprep.subr.msk.bf16.mxu0 %vm2035_vm2, %v2019_v55 }
 0x404   : > { %v2007_v32 = vadd.f32 0.5, %v1975_v25 }
 0x405   : > { %v2005_v33 = vadd.f32 0.5, %v1973_v28 }
 0x406   : > { %v2023_v40 = vpack.c.bf16 %v2007_v32, %v2006_v14 }
 0x407   : > { %v2022_v41 = vpack.c.bf16 %v2005_v33, %v2004_v27 }
 0x40a   : > { %2410 = vmatpush3.bf16.xpose.msra.mxu0 %v2049_v45 }
 0x40b   : > { %2585 = vmatprep.subr.msk.bf16.mxu0 %vm2035_vm2, %v2020_v20 }
 0x412   : > { %2412 = vmatpush3.bf16.xpose.msra.mxu0 %v2052_v38 }
 0x413   : > { %2586 = vmatprep.subr.msk.bf16.mxu0 %vm2035_vm2, %v2021_v18 }
 0x41a   : > { %2414 = vmatpush3.bf16.xpose.msra.mxu0 %v2055_v39 }
 0x41b   : > { %2587 = vmatprep.subr.msk.bf16.mxu0 %vm2035_vm2, %v2022_v41 }
 0x422   : > { %2416 = vmatpush3.bf16.xpose.msra.mxu0 %v2058_v34 }
 0x423   : > { %2588 = vmatprep.subr.msk.bf16.mxu0 %vm2035_vm2, %v2023_v40 }
 0x42a   : > { %2418 = vmatpush3.bf16.xpose.msra.mxu0 %v2061_v35 }
 0x431   : > { %2420 = vmatmul.mubr.msk.bf16.vlgmr.msra.gmra.mrb[64].mxu0 %vm2035_vm2, %v3329_v26 }
 0x504   : > { %v2121_v36 = vpop.f32.mrb[64].mxu0 }
 0x505   : > { %v2122_v37 = vadd.f32 %v2121_v36, %v2034_v4  ;;  %v2123_v29 = vpop.f32.mrb[65].mxu0 }
 0x506   : > { %v2124_v31 = vadd.f32 %v2123_v29, %v2034_v4  ;;  %v2125_v46 = vpop.f32.mrb[66].mxu0 }
 0x507   : > { %v2126_v47 = vpop.f32.mrb[67].mxu0 }
 0x508   : > { %v2130_v26 = vcombine.low %v2122_v37, %v2124_v31 }
 0x50a   : > { %v2137_v48 = vrot.slane %v2130_v26, %v2136_v43 }
 0x50c   : > { %v2144_v49 = vrot.slane %v2137_v48, %v2136_v43 }
 0x50e   : > { %2150 = vst.msk [vmem:[%s382_s17] sm:$0x3] %vm2148_vm3, %v2144_v49 }
 0x50f   : > { %2932 = shalt.err (!%p2929_p3)
}
 0x510   : > { %s2933_s13 = scalar_lea.hbm %s3465_s10, 32  ;;  %s2937_s23 = scalar_lea.hbm %s3518_s11, 64 }
 0x511   : > { %p2934_p4 = scmp.ne.s32.totalorder %s3465_s10, %s2933_s13  ;;  %p2938_p9 = scmp.lt.u32.totalorder %s3465_s10, %s3518_s11 }
 0x512   : > { %p2939_p10 = scmp.lt.u32.totalorder %s2937_s23, %s2933_s13  ;;  %p2941_p12 = scmp.lt.u32.totalorder %s2933_s13, %s3465_s10 }
 0x513   : > { %p2935_p7 = pnand %p2934_p4, %p3084_p5 }
 0x514   : > { %p2940_p11 = por %p2939_p10, %p2938_p9 }
 0x515   : > { %p2936_p8 = pneg %p2935_p7 }
 0x516   : > { %p2942_p13 = por %p2941_p12, %p2940_p11 }
 0x518   : > { %p2943_p0 = pnand %p2942_p13, %p2936_p8 }
 0x51a   : > { %2946 = shalt.err (!%p2943_p0)
}
 0x51b   : > { %2589 = dma.vmem_to_hbm [thread:$0]  (%p3084_p5), %s3467_s18, 32, %s3465_s10, %s2152_s26  }
 0x51c PF: > { %p2595_p1 = scmp.ge.s32.totalorder %s2981_s22, 2  ;;  %s2178_s30 = sand.u32 1, %s2969_s19  }
 0x51d   : > { %s2179_s14 = scalar_lea.sflag [#allocation4], %s2178_s30 }
 0x51e   : > { %p2592_p2 = pnand %p2595_p1, %p3088_p6 }
 0x520   : > { %2964 = dma.done.wait (!%p2592_p2), %s2179_s14, 32  }
 0x521   : > { %2966 = vsyncadd (!%p2592_p2), %s2179_s14, 4294967264  ;;  %p23_p3 = scmp.ge.s32.totalorder %s3072_s24, 4   ;;  %s3521_s19 = smov %s2973_s20 }
 0x522   : > { %s3522_s20 = smov %s2977_s21  ;;  %s3523_s21 = smov %s3082_s27 }
 0x523   : > { %s3524_s22 = smov %s3072_s24  ;;  %25 = sbr.rel (!%p23_p3) target bundleno = 6 (0x6), region = 99 }
 0x52a   :  { %2184 = vsyncpa [#allocation4], 1 }
 0x52b   :  { %2186 = vsyncpa [#allocation4 + $0x1], 1 }

</bundles_post_ra>
